<compile_context>
chip_gen: v7x
topology: tpu7x:2x2x1
jax: 0.10.0
libtpu: 0.0.40
codegen_flags: <defaults>
</compile_context>

<pallas_src>
import math
from functools import partial

import jax
import jax.numpy as jnp
from jax import lax
from jax.experimental import pallas as pl
from jax.experimental.pallas import tpu as pltpu


BT = 8  # sequences per grid step (fills the 8 sublanes of a vreg)


# ----------------------------- Pallas kernel ---------------------------------

def birnn_kernel(len_ref,            # VMEM (BT, 1) int32 sequence lengths
                 x_ref,              # VMEM (L, BT, D) time-major embeddings
                 wih_ref,            # VMEM (D, 8H)   cols: [fwd i,f,g,o | rev i,f,g,o]
                 whh_f_ref,          # VMEM (H, 4H)
                 whh_r_ref,          # VMEM (H, 4H)
                 b_ref,              # VMEM (1, 8H)   bias_ih + bias_hh, both directions
                 out_f_ref,          # VMEM (L, BT, H) forward per-step outputs
                 out_r_ref,          # VMEM (L, BT, H) reverse per-step outputs
                 state_ref,          # VMEM (BT, 4H)   [h_f | h_r | c_f | c_r]
                 xg_f_ref,           # VMEM scratch (L, BT, 4H)
                 xg_r_ref):          # VMEM scratch (L, BT, 4H)
    L, Bt, D = x_ref.shape
    H = whh_f_ref.shape[0]
    G = 4 * H

    n = len_ref[...]                                   # (BT, 1) int32

    # One fused MXU pass: all timesteps through both directions' input weights
    # (+ folded biases), staged time-major so each step reads one dense row.
    x2d = x_ref[...].reshape(L * Bt, D)
    xg = jnp.dot(x2d, wih_ref[...], preferred_element_type=jnp.float32) + b_ref[...]
    xg_f_ref[...] = xg[:, :G].reshape(L, Bt, G)
    xg_r_ref[...] = xg[:, G:].reshape(L, Bt, G)

    # Hoist the recurrent weights only while they are a handful of vregs;
    # at H >= 128 pinning them would spill across every unrolled step.
    hoist = H <= 64
    whh_f = whh_f_ref[...] if hoist else None
    whh_r = whh_r_ref[...] if hoist else None

    def cell(pre, c):
        i = jax.nn.sigmoid(pre[:, 0:H])
        f = jax.nn.sigmoid(pre[:, H:2 * H])
        g = jnp.tanh(pre[:, 2 * H:3 * H])
        o = jax.nn.sigmoid(pre[:, 3 * H:4 * H])
        c_new = f * c + i * g
        return o * jnp.tanh(c_new), c_new

    def body(k, carry):
        h_f, c_f, h_r, c_r = carry
        r = L - 1 - k
        valid_f = k < n                                # (BT, 1) per-sequence masks
        valid_r = r < n

        wf = whh_f if hoist else whh_f_ref[...]
        wr = whh_r if hoist else whh_r_ref[...]

        # Two independent small MXU dots (fwd / rev chains overlap in the VLIW
        # schedule); x-gate addends are whole-row ref reads from the scratches.
        pre_f = xg_f_ref[k] + jnp.dot(h_f, wf, preferred_element_type=jnp.float32)
        pre_r = xg_r_ref[r] + jnp.dot(h_r, wr, preferred_element_type=jnp.float32)

        hf_new, cf_new = cell(pre_f, c_f)
        hr_new, cr_new = cell(pre_r, c_r)

        # Each output row is written exactly once per direction; rows past a
        # sequence's end (k >= n, resp. r >= n) receive zeros, so no up-front
        # zero fill and no predicated stores are needed.
        out_f_ref[k] = jnp.where(valid_f, hf_new, 0.0)
        out_r_ref[r] = jnp.where(valid_r, hr_new, 0.0)

        h_f = jnp.where(valid_f, hf_new, h_f)
        c_f = jnp.where(valid_f, cf_new, c_f)
        h_r = jnp.where(valid_r, hr_new, h_r)
        c_r = jnp.where(valid_r, cr_new, c_r)
        return h_f, c_f, h_r, c_r

    zeros = jnp.zeros((Bt, H), jnp.float32)
    unroll = True if L <= 16 else 8                    # partial unroll at long L
    h_f, c_f, h_r, c_r = lax.fori_loop(0, L, body, (zeros, zeros, zeros, zeros),
                                       unroll=unroll)

    state_ref[...] = jnp.concatenate([h_f, h_r, c_f, c_r], axis=1)   # (BT, 4H)


# ------------------------------ JAX wrapper -----------------------------------

@jax.jit
def bi_lstm_encoder_batch(x, seq_lens, wih_cat, whh_f, whh_r, b_cat):
    """x: (B, L, D) f32; seq_lens: (B,) int32.  Returns (outputs, hidden, cell)."""
    B, L, D = x.shape
    H = whh_f.shape[0]
    Bp = ((B + BT - 1) // BT) * BT
    pad = Bp - B

    # Time-major layout so a batch tile's timestep row is one dense (BT, 4H) tile.
    xt = jnp.transpose(jnp.pad(x, ((0, pad), (0, 0), (0, 0))), (1, 0, 2))   # (L, Bp, D)
    lens = jnp.pad(seq_lens.astype(jnp.int32), (0, pad)).reshape(Bp, 1)

    grid_spec = pltpu.PrefetchScalarGridSpec(
        num_scalar_prefetch=0,
        grid=(Bp // BT,),
        in_specs=[
            pl.BlockSpec((BT, 1), lambda b: (b, 0)),          # lengths
            pl.BlockSpec((L, BT, D), lambda b: (0, b, 0)),    # embeddings (time-major)
            pl.BlockSpec((D, 8 * H), lambda b: (0, 0)),       # weights stay VMEM-resident
            pl.BlockSpec((H, 4 * H), lambda b: (0, 0)),
            pl.BlockSpec((H, 4 * H), lambda b: (0, 0)),
            pl.BlockSpec((1, 8 * H), lambda b: (0, 0)),
        ],
        out_specs=[
            pl.BlockSpec((L, BT, H), lambda b: (0, b, 0)),    # fwd outputs
            pl.BlockSpec((L, BT, H), lambda b: (0, b, 0)),    # rev outputs
            pl.BlockSpec((BT, 4 * H), lambda b: (b, 0)),      # [h_f|h_r|c_f|c_r]
        ],
        scratch_shapes=[
            pltpu.VMEM((L, BT, 4 * H), jnp.float32),
            pltpu.VMEM((L, BT, 4 * H), jnp.float32),
        ],
    )

    out_f, out_r, state = pl.pallas_call(
        birnn_kernel,
        out_shape=(
            jax.ShapeDtypeStruct((L, Bp, H), jnp.float32),
            jax.ShapeDtypeStruct((L, Bp, H), jnp.float32),
            jax.ShapeDtypeStruct((Bp, 4 * H), jnp.float32),
        ),
        grid_spec=grid_spec,
        compiler_params=pltpu.CompilerParams(
            dimension_semantics=("parallel",)),
    )(lens, xt, wih_cat, whh_f, whh_r, b_cat)

    outputs = jnp.transpose(jnp.concatenate([out_f, out_r], axis=-1), (1, 0, 2))[:B]
    hidden = state[:B, :2 * H].reshape(B, 1, 2 * H)
    cell = state[:B, 2 * H:].reshape(B, 1, 2 * H)
    return outputs, hidden, cell


def pretrained_embedding_encoder_forward(x, seq_len, p):
    """Single-sentence forward matching PreTrainedEmbeddingEncoderBiRNN.forward."""
    outputs, hidden, cell = bi_lstm_encoder_batch(
        x[None], jnp.asarray([seq_len], jnp.int32),
        p["wih_cat"], p["whh_f"], p["whh_r"], p["b_cat"])
    H = p["whh_f"].shape[0]
    outputs = outputs[0]                          # (max_length, 2H)
    hidden = hidden.reshape(1, 1, 2 * H)
    cell = cell.reshape(1, 1, 2 * H)
    # projected_output == (hidden, cell) in the reference module.
    return outputs, (hidden, cell), (hidden, cell)


# --------------------------- deterministic params ------------------------------

def init_lstm_params(key, input_size, hidden_size):
    """torch.nn.LSTM-style uniform(-1/sqrt(H), 1/sqrt(H)) init, laid out for the kernel."""
    H = hidden_size
    k = 1.0 / math.sqrt(H)
    keys = jax.random.split(key, 8)

    def u(kk, shape):
        return jax.random.uniform(kk, shape, jnp.float32, minval=-k, maxval=k)

    # PyTorch layout: weight_ih (4H, D), weight_hh (4H, H), bias_ih/hh (4H,)
    wih_f = u(keys[0], (4 * H, input_size))
    whh_f = u(keys[1], (4 * H, H))
    b_f = u(keys[2], (4 * H,)) + u(keys[3], (4 * H,))
    wih_r = u(keys[4], (4 * H, input_size))
    whh_r = u(keys[5], (4 * H, H))
    b_r = u(keys[6], (4 * H,)) + u(keys[7], (4 * H,))

    return dict(
        # per-direction layout (used by the pure-JAX reference)
        wih_f=wih_f.T, b_f=b_f.reshape(1, 4 * H),
        wih_r=wih_r.T, b_r=b_r.reshape(1, 4 * H),
        # kernel layout
        whh_f=whh_f.T,                                              # (H, 4H)
        whh_r=whh_r.T,                                              # (H, 4H)
        wih_cat=jnp.concatenate([wih_f.T, wih_r.T], axis=1),        # (D, 8H)
        b_cat=jnp.concatenate([b_f, b_r]).reshape(1, 8 * H),        # (1, 8H)
    )


# ------------------------------ pure-JAX reference -----------------------------

@partial(jax.jit, static_argnums=(1,))
def reference_forward(x, seq_len, p):
    """Literal translation of the torch forward for one sentence (no masking tricks)."""
    L, D = x.shape
    H = p["whh_f"].shape[0]

    def step(xrow, h, c, wih, whh, b):
        pre = xrow @ wih + h @ whh + b
        i = jax.nn.sigmoid(pre[:, 0:H])
        f = jax.nn.sigmoid(pre[:, H:2 * H])
        g = jnp.tanh(pre[:, 2 * H:3 * H])
        o = jax.nn.sigmoid(pre[:, 3 * H:4 * H])
        c = f * c + i * g
        h = o * jnp.tanh(c)
        return h, c

    fwd_out = jnp.zeros((L, H), jnp.float32)
    rev_out = jnp.zeros((L, H), jnp.float32)
    h = jnp.zeros((1, H), jnp.float32); c = jnp.zeros((1, H), jnp.float32)
    for k in range(seq_len):
        h, c = step(x[k:k + 1], h, c, p["wih_f"], p["whh_f"], p["b_f"])
        fwd_out = fwd_out.at[k].set(h[0])
    h_f, c_f = h, c

    h = jnp.zeros((1, H), jnp.float32); c = jnp.zeros((1, H), jnp.float32)
    for idx in range(seq_len - 1, -1, -1):
        h, c = step(x[idx:idx + 1], h, c, p["wih_r"], p["whh_r"], p["b_r"])
        rev_out = rev_out.at[idx].set(h[0])
    h_r, c_r = h, c

    outputs = jnp.concatenate([fwd_out, rev_out], axis=1)
    hidden = jnp.concatenate([h_f, h_r], axis=1).reshape(1, 1, 2 * H)
    cell = jnp.concatenate([c_f, c_r], axis=1).reshape(1, 1, 2 * H)
    return outputs, hidden, cell


# ---------------------------------- main ---------------------------------------

if __name__ == "__main__":
    key = jax.random.PRNGKey(0)
    k_emb, k_lstm, k_len, k_tok = jax.random.split(key, 4)

    input_size = 16      # word_vectors.vector_size
    hidden_size = 32
    max_length = 8
    vocab_size = 20
    batch = 16           # 2 grid tiles of BT=8 -> >=2 parallel grid steps for megacore

    # Pre-trained word-vector table (stands in for the gensim KeyedVectors lookup).
    emb_table = jax.random.normal(k_emb, (vocab_size, input_size), jnp.float32)

    # Deterministic "sentences": random lengths 1..max_length, token id -1 marks an
    # OOV word -> empty (zero) vector, positions >= seq_len stay zero.
    seq_lens = jax.random.randint(k_len, (batch,), 1, max_length + 1).astype(jnp.int32)
    token_ids = jax.random.randint(k_tok, (batch, max_length), -1, vocab_size)

    def embed(tok, lens):
        safe = jnp.clip(tok, 0, vocab_size - 1)
        e = jnp.where((tok >= 0)[..., None], emb_table[safe], 0.0)
        pos = jnp.arange(max_length)[None, :, None]
        return jnp.where(pos < lens[:, None, None], e, 0.0)

    x = jnp.asarray(embed(token_ids, seq_lens), jnp.float32)         # (B, L, D)

    params = init_lstm_params(k_lstm, input_size, hidden_size)

    outputs, hidden, cell = bi_lstm_encoder_batch(
        x, seq_lens, params["wih_cat"], params["whh_f"],
        params["whh_r"], params["b_cat"])
    jax.block_until_ready((outputs, hidden, cell))

    assert outputs.shape == (batch, max_length, 2 * hidden_size)
    assert hidden.shape == (batch, 1, 2 * hidden_size)
    assert cell.shape == (batch, 1, 2 * hidden_size)

    for b in range(batch):
        ref_out, ref_hid, ref_cell = reference_forward(x[b], int(seq_lens[b]), params)
        assert jnp.allclose(outputs[b], ref_out, atol=1e-5), f"outputs mismatch (seq {b})"
        assert jnp.allclose(hidden[b][None], ref_hid, atol=1e-5), f"hidden mismatch (seq {b})"
        assert jnp.allclose(cell[b][None], ref_cell, atol=1e-5), f"cell mismatch (seq {b})"

    # Module-style single-sentence interface (sentence 0).
    out0, (hid0, cel0), _ = pretrained_embedding_encoder_forward(
        x[0], int(seq_lens[0]), params)
    jax.block_until_ready((out0, hid0, cel0))
    assert out0.shape == (max_length, 2 * hidden_size)
    assert hid0.shape == (1, 1, 2 * hidden_size)
    assert jnp.allclose(out0, outputs[0], atol=1e-6)
    assert jnp.allclose(hid0[0], hidden[0], atol=1e-6)
    assert jnp.allclose(cel0[0], cell[0], atol=1e-6)

    print("KERNEL_OK")
</pallas_src>

<mosaic_0001>
module attributes {stable_mosaic.version = 11 : i64} {
  func.func @birnn_kernel(%arg0: i32, %arg1: memref<8x1xi32, #tpu.memory_space<vmem>>, %arg2: memref<8x8x16xf32, #tpu.memory_space<vmem>>, %arg3: memref<16x256xf32, #tpu.memory_space<vmem>>, %arg4: memref<32x128xf32, #tpu.memory_space<vmem>>, %arg5: memref<32x128xf32, #tpu.memory_space<vmem>>, %arg6: memref<1x256xf32, #tpu.memory_space<vmem>>, %arg7: memref<8x8x32xf32, #tpu.memory_space<vmem>>, %arg8: memref<8x8x32xf32, #tpu.memory_space<vmem>>, %arg9: memref<8x128xf32, #tpu.memory_space<vmem>>, %arg10: memref<8x8x128xf32, #tpu.memory_space<vmem>>, %arg11: memref<8x8x128xf32, #tpu.memory_space<vmem>>) attributes {dimension_semantics = [#tpu.dimension_semantics<parallel>], iteration_bounds = array<i64: 2>, scalar_prefetch = 0 : i64, scratch_operands = 2 : i64, tpu.core_type = #tpu.core_type<tc>, window_params = [{transform_indices = @transform_0, window_bounds = array<i64: 8, 1>}, {transform_indices = @transform_1, window_bounds = array<i64: 8, 8, 16>}, {pipeline_mode = #tpu.pipeline_mode<synchronous>, transform_indices = @transform_2, window_bounds = array<i64: 16, 256>}, {pipeline_mode = #tpu.pipeline_mode<synchronous>, transform_indices = @transform_3, window_bounds = array<i64: 32, 128>}, {pipeline_mode = #tpu.pipeline_mode<synchronous>, transform_indices = @transform_4, window_bounds = array<i64: 32, 128>}, {pipeline_mode = #tpu.pipeline_mode<synchronous>, transform_indices = @transform_5, window_bounds = array<i64: 1, 256>}, {transform_indices = @transform_6, window_bounds = array<i64: 8, 8, 32>}, {transform_indices = @transform_7, window_bounds = array<i64: 8, 8, 32>}, {transform_indices = @transform_8, window_bounds = array<i64: 8, 128>}]} {
    %c0 = arith.constant 0 : index
    %c0_0 = arith.constant 0 : index
    %0 = vector.load %arg1[%c0, %c0_0] : memref<8x1xi32, #tpu.memory_space<vmem>>, vector<8x1xi32>
    %c0_1 = arith.constant 0 : index
    %c0_2 = arith.constant 0 : index
    %c0_3 = arith.constant 0 : index
    %1 = vector.load %arg2[%c0_1, %c0_2, %c0_3] : memref<8x8x16xf32, #tpu.memory_space<vmem>>, vector<8x8x16xf32>
    %2 = vector.shape_cast %1 : vector<8x8x16xf32> to vector<64x16xf32>
    %c0_4 = arith.constant 0 : index
    %c0_5 = arith.constant 0 : index
    %3 = vector.load %arg3[%c0_4, %c0_5] : memref<16x256xf32, #tpu.memory_space<vmem>>, vector<16x256xf32>
    %cst = arith.constant dense<0.000000e+00> : vector<64x256xf32>
    %4 = tpu.matmul %2, %3, %cst {dimension_numbers = #tpu.dot_dimension_numbers<[1], [0], [0], [1], [0, 0, 1, 1], [], []>} : vector<64x16xf32>, vector<16x256xf32>, vector<64x256xf32> -> vector<64x256xf32>
    %c0_6 = arith.constant 0 : index
    %c0_7 = arith.constant 0 : index
    %5 = vector.load %arg6[%c0_6, %c0_7] : memref<1x256xf32, #tpu.memory_space<vmem>>, vector<1x256xf32>
    %6 = vector.broadcast %5 : vector<1x256xf32> to vector<64x256xf32>
    %7 = arith.addf %4, %6 : vector<64x256xf32>
    %8 = vector.extract_strided_slice %7 {offsets = [0, 0], sizes = [64, 128], strides = [1, 1]} : vector<64x256xf32> to vector<64x128xf32>
    %9 = vector.shape_cast %8 : vector<64x128xf32> to vector<8x8x128xf32>
    %c0_8 = arith.constant 0 : index
    %c0_9 = arith.constant 0 : index
    %c0_10 = arith.constant 0 : index
    %10 = vector.load %arg10[%c0_8, %c0_9, %c0_10] : memref<8x8x128xf32, #tpu.memory_space<vmem>>, vector<8x8x128xf32>
    tpu.vector_store %arg10[%c0_8, %c0_9, %c0_10], %9 {strides = array<i32>} : memref<8x8x128xf32, #tpu.memory_space<vmem>>, vector<8x8x128xf32>,
    %11 = vector.extract_strided_slice %7 {offsets = [0, 128], sizes = [64, 128], strides = [1, 1]} : vector<64x256xf32> to vector<64x128xf32>
    %12 = vector.shape_cast %11 : vector<64x128xf32> to vector<8x8x128xf32>
    %c0_11 = arith.constant 0 : index
    %c0_12 = arith.constant 0 : index
    %c0_13 = arith.constant 0 : index
    %13 = vector.load %arg11[%c0_11, %c0_12, %c0_13] : memref<8x8x128xf32, #tpu.memory_space<vmem>>, vector<8x8x128xf32>
    tpu.vector_store %arg11[%c0_11, %c0_12, %c0_13], %12 {strides = array<i32>} : memref<8x8x128xf32, #tpu.memory_space<vmem>>, vector<8x8x128xf32>,
    %c0_14 = arith.constant 0 : index
    %c0_15 = arith.constant 0 : index
    %14 = vector.load %arg4[%c0_14, %c0_15] : memref<32x128xf32, #tpu.memory_space<vmem>>, vector<32x128xf32>
    %c0_16 = arith.constant 0 : index
    %c0_17 = arith.constant 0 : index
    %15 = vector.load %arg5[%c0_16, %c0_17] : memref<32x128xf32, #tpu.memory_space<vmem>>, vector<32x128xf32>
    %cst_18 = arith.constant 0.000000e+00 : f32
    %16 = vector.broadcast %cst_18 : f32 to vector<8x32xf32>
    %c0_i32 = arith.constant 0 : i32
    %c7_i32 = arith.constant 7 : i32
    %17 = arith.subi %c7_i32, %c0_i32 : i32
    %18 = vector.broadcast %c0_i32 : i32 to vector<8x1xi32>
    %19 = arith.cmpi slt, %18, %0 : vector<8x1xi32>
    %20 = vector.broadcast %17 : i32 to vector<8x1xi32>
    %21 = arith.cmpi slt, %20, %0 : vector<8x1xi32>
    %22 = arith.index_cast %c0_i32 : i32 to index
    %c0_19 = arith.constant 0 : index
    %c0_20 = arith.constant 0 : index
    %23 = vector.load %arg10[%22, %c0_19, %c0_20] : memref<8x8x128xf32, #tpu.memory_space<vmem>>, vector<1x8x128xf32>
    %24 = vector.shape_cast %23 : vector<1x8x128xf32> to vector<8x128xf32>
    %cst_21 = arith.constant dense<0.000000e+00> : vector<8x128xf32>
    %25 = tpu.matmul %16, %14, %cst_21 {dimension_numbers = #tpu.dot_dimension_numbers<[1], [0], [0], [1], [0, 0, 1, 1], [], []>} : vector<8x32xf32>, vector<32x128xf32>, vector<8x128xf32> -> vector<8x128xf32>
    %26 = arith.addf %24, %25 : vector<8x128xf32>
    %27 = arith.index_cast %17 : i32 to index
    %c0_22 = arith.constant 0 : index
    %c0_23 = arith.constant 0 : index
    %28 = vector.load %arg11[%27, %c0_22, %c0_23] : memref<8x8x128xf32, #tpu.memory_space<vmem>>, vector<1x8x128xf32>
    %29 = vector.shape_cast %28 : vector<1x8x128xf32> to vector<8x128xf32>
    %cst_24 = arith.constant dense<0.000000e+00> : vector<8x128xf32>
    %30 = tpu.matmul %16, %15, %cst_24 {dimension_numbers = #tpu.dot_dimension_numbers<[1], [0], [0], [1], [0, 0, 1, 1], [], []>} : vector<8x32xf32>, vector<32x128xf32>, vector<8x128xf32> -> vector<8x128xf32>
    %31 = arith.addf %29, %30 : vector<8x128xf32>
    %32 = vector.extract_strided_slice %26 {offsets = [0, 0], sizes = [8, 32], strides = [1, 1]} : vector<8x128xf32> to vector<8x32xf32>
    %33 = arith.negf %32 : vector<8x32xf32>
    %34 = math.exp %33 : vector<8x32xf32>
    %cst_25 = arith.constant 1.000000e+00 : f32
    %35 = vector.broadcast %cst_25 : f32 to vector<8x32xf32>
    %36 = arith.addf %35, %34 : vector<8x32xf32>
    %37 = arith.divf %35, %36 : vector<8x32xf32>
    %38 = vector.extract_strided_slice %26 {offsets = [0, 32], sizes = [8, 32], strides = [1, 1]} : vector<8x128xf32> to vector<8x32xf32>
    %39 = arith.negf %38 : vector<8x32xf32>
    %40 = math.exp %39 : vector<8x32xf32>
    %cst_26 = arith.constant 1.000000e+00 : f32
    %41 = vector.broadcast %cst_26 : f32 to vector<8x32xf32>
    %42 = arith.addf %41, %40 : vector<8x32xf32>
    %43 = arith.divf %41, %42 : vector<8x32xf32>
    %44 = vector.extract_strided_slice %26 {offsets = [0, 64], sizes = [8, 32], strides = [1, 1]} : vector<8x128xf32> to vector<8x32xf32>
    %45 = math.tanh %44 : vector<8x32xf32>
    %46 = vector.extract_strided_slice %26 {offsets = [0, 96], sizes = [8, 32], strides = [1, 1]} : vector<8x128xf32> to vector<8x32xf32>
    %47 = arith.negf %46 : vector<8x32xf32>
    %48 = math.exp %47 : vector<8x32xf32>
    %cst_27 = arith.constant 1.000000e+00 : f32
    %49 = vector.broadcast %cst_27 : f32 to vector<8x32xf32>
    %50 = arith.addf %49, %48 : vector<8x32xf32>
    %51 = arith.divf %49, %50 : vector<8x32xf32>
    %52 = arith.mulf %43, %16 : vector<8x32xf32>
    %53 = arith.mulf %37, %45 : vector<8x32xf32>
    %54 = arith.addf %52, %53 : vector<8x32xf32>
    %55 = math.tanh %54 : vector<8x32xf32>
    %56 = arith.mulf %51, %55 : vector<8x32xf32>
    %57 = vector.extract_strided_slice %31 {offsets = [0, 0], sizes = [8, 32], strides = [1, 1]} : vector<8x128xf32> to vector<8x32xf32>
    %58 = arith.negf %57 : vector<8x32xf32>
    %59 = math.exp %58 : vector<8x32xf32>
    %cst_28 = arith.constant 1.000000e+00 : f32
    %60 = vector.broadcast %cst_28 : f32 to vector<8x32xf32>
    %61 = arith.addf %60, %59 : vector<8x32xf32>
    %62 = arith.divf %60, %61 : vector<8x32xf32>
    %63 = vector.extract_strided_slice %31 {offsets = [0, 32], sizes = [8, 32], strides = [1, 1]} : vector<8x128xf32> to vector<8x32xf32>
    %64 = arith.negf %63 : vector<8x32xf32>
    %65 = math.exp %64 : vector<8x32xf32>
    %cst_29 = arith.constant 1.000000e+00 : f32
    %66 = vector.broadcast %cst_29 : f32 to vector<8x32xf32>
    %67 = arith.addf %66, %65 : vector<8x32xf32>
    %68 = arith.divf %66, %67 : vector<8x32xf32>
    %69 = vector.extract_strided_slice %31 {offsets = [0, 64], sizes = [8, 32], strides = [1, 1]} : vector<8x128xf32> to vector<8x32xf32>
    %70 = math.tanh %69 : vector<8x32xf32>
    %71 = vector.extract_strided_slice %31 {offsets = [0, 96], sizes = [8, 32], strides = [1, 1]} : vector<8x128xf32> to vector<8x32xf32>
    %72 = arith.negf %71 : vector<8x32xf32>
    %73 = math.exp %72 : vector<8x32xf32>
    %cst_30 = arith.constant 1.000000e+00 : f32
    %74 = vector.broadcast %cst_30 : f32 to vector<8x32xf32>
    %75 = arith.addf %74, %73 : vector<8x32xf32>
    %76 = arith.divf %74, %75 : vector<8x32xf32>
    %77 = arith.mulf %68, %16 : vector<8x32xf32>
    %78 = arith.mulf %62, %70 : vector<8x32xf32>
    %79 = arith.addf %77, %78 : vector<8x32xf32>
    %80 = math.tanh %79 : vector<8x32xf32>
    %81 = arith.mulf %76, %80 : vector<8x32xf32>
    %cst_31 = arith.constant 0.000000e+00 : f32
    %82 = vector.shape_cast %19 : vector<8x1xi1> to vector<8x1xi1>
    %83 = vector.broadcast %82 : vector<8x1xi1> to vector<8x32xi1>
    %84 = vector.broadcast %cst_31 : f32 to vector<8x32xf32>
    %85 = arith.select %83, %56, %84 : vector<8x32xi1>, vector<8x32xf32>
    %86 = arith.index_cast %c0_i32 : i32 to index
    %c0_32 = arith.constant 0 : index
    %c0_33 = arith.constant 0 : index
    %87 = vector.load %arg7[%86, %c0_32, %c0_33] : memref<8x8x32xf32, #tpu.memory_space<vmem>>, vector<1x8x32xf32>
    %88 = vector.shape_cast %87 : vector<1x8x32xf32> to vector<8x32xf32>
    %89 = vector.shape_cast %85 : vector<8x32xf32> to vector<1x8x32xf32>
    tpu.vector_store %arg7[%86, %c0_32, %c0_33], %89 {strides = array<i32>} : memref<8x8x32xf32, #tpu.memory_space<vmem>>, vector<1x8x32xf32>,
    %cst_34 = arith.constant 0.000000e+00 : f32
    %90 = vector.shape_cast %21 : vector<8x1xi1> to vector<8x1xi1>
    %91 = vector.broadcast %90 : vector<8x1xi1> to vector<8x32xi1>
    %92 = vector.broadcast %cst_34 : f32 to vector<8x32xf32>
    %93 = arith.select %91, %81, %92 : vector<8x32xi1>, vector<8x32xf32>
    %94 = arith.index_cast %17 : i32 to index
    %c0_35 = arith.constant 0 : index
    %c0_36 = arith.constant 0 : index
    %95 = vector.load %arg8[%94, %c0_35, %c0_36] : memref<8x8x32xf32, #tpu.memory_space<vmem>>, vector<1x8x32xf32>
    %96 = vector.shape_cast %95 : vector<1x8x32xf32> to vector<8x32xf32>
    %97 = vector.shape_cast %93 : vector<8x32xf32> to vector<1x8x32xf32>
    tpu.vector_store %arg8[%94, %c0_35, %c0_36], %97 {strides = array<i32>} : memref<8x8x32xf32, #tpu.memory_space<vmem>>, vector<1x8x32xf32>,
    %98 = vector.shape_cast %19 : vector<8x1xi1> to vector<8x1xi1>
    %99 = vector.broadcast %98 : vector<8x1xi1> to vector<8x32xi1>
    %100 = arith.select %99, %56, %16 : vector<8x32xi1>, vector<8x32xf32>
    %101 = vector.shape_cast %19 : vector<8x1xi1> to vector<8x1xi1>
    %102 = vector.broadcast %101 : vector<8x1xi1> to vector<8x32xi1>
    %103 = arith.select %102, %54, %16 : vector<8x32xi1>, vector<8x32xf32>
    %104 = vector.shape_cast %21 : vector<8x1xi1> to vector<8x1xi1>
    %105 = vector.broadcast %104 : vector<8x1xi1> to vector<8x32xi1>
    %106 = arith.select %105, %81, %16 : vector<8x32xi1>, vector<8x32xf32>
    %107 = vector.shape_cast %21 : vector<8x1xi1> to vector<8x1xi1>
    %108 = vector.broadcast %107 : vector<8x1xi1> to vector<8x32xi1>
    %109 = arith.select %108, %79, %16 : vector<8x32xi1>, vector<8x32xf32>
    %c1_i32 = arith.constant 1 : i32
    %c7_i32_37 = arith.constant 7 : i32
    %110 = arith.subi %c7_i32_37, %c1_i32 : i32
    %111 = vector.broadcast %c1_i32 : i32 to vector<8x1xi32>
    %112 = arith.cmpi slt, %111, %0 : vector<8x1xi32>
    %113 = vector.broadcast %110 : i32 to vector<8x1xi32>
    %114 = arith.cmpi slt, %113, %0 : vector<8x1xi32>
    %115 = arith.index_cast %c1_i32 : i32 to index
    %c0_38 = arith.constant 0 : index
    %c0_39 = arith.constant 0 : index
    %116 = vector.load %arg10[%115, %c0_38, %c0_39] : memref<8x8x128xf32, #tpu.memory_space<vmem>>, vector<1x8x128xf32>
    %117 = vector.shape_cast %116 : vector<1x8x128xf32> to vector<8x128xf32>
    %cst_40 = arith.constant dense<0.000000e+00> : vector<8x128xf32>
    %118 = tpu.matmul %100, %14, %cst_40 {dimension_numbers = #tpu.dot_dimension_numbers<[1], [0], [0], [1], [0, 0, 1, 1], [], []>} : vector<8x32xf32>, vector<32x128xf32>, vector<8x128xf32> -> vector<8x128xf32>
    %119 = arith.addf %117, %118 : vector<8x128xf32>
    %120 = arith.index_cast %110 : i32 to index
    %c0_41 = arith.constant 0 : index
    %c0_42 = arith.constant 0 : index
    %121 = vector.load %arg11[%120, %c0_41, %c0_42] : memref<8x8x128xf32, #tpu.memory_space<vmem>>, vector<1x8x128xf32>
    %122 = vector.shape_cast %121 : vector<1x8x128xf32> to vector<8x128xf32>
    %cst_43 = arith.constant dense<0.000000e+00> : vector<8x128xf32>
    %123 = tpu.matmul %106, %15, %cst_43 {dimension_numbers = #tpu.dot_dimension_numbers<[1], [0], [0], [1], [0, 0, 1, 1], [], []>} : vector<8x32xf32>, vector<32x128xf32>, vector<8x128xf32> -> vector<8x128xf32>
    %124 = arith.addf %122, %123 : vector<8x128xf32>
    %125 = vector.extract_strided_slice %119 {offsets = [0, 0], sizes = [8, 32], strides = [1, 1]} : vector<8x128xf32> to vector<8x32xf32>
    %126 = arith.negf %125 : vector<8x32xf32>
    %127 = math.exp %126 : vector<8x32xf32>
    %cst_44 = arith.constant 1.000000e+00 : f32
    %128 = vector.broadcast %cst_44 : f32 to vector<8x32xf32>
    %129 = arith.addf %128, %127 : vector<8x32xf32>
    %130 = arith.divf %128, %129 : vector<8x32xf32>
    %131 = vector.extract_strided_slice %119 {offsets = [0, 32], sizes = [8, 32], strides = [1, 1]} : vector<8x128xf32> to vector<8x32xf32>
    %132 = arith.negf %131 : vector<8x32xf32>
    %133 = math.exp %132 : vector<8x32xf32>
    %cst_45 = arith.constant 1.000000e+00 : f32
    %134 = vector.broadcast %cst_45 : f32 to vector<8x32xf32>
    %135 = arith.addf %134, %133 : vector<8x32xf32>
    %136 = arith.divf %134, %135 : vector<8x32xf32>
    %137 = vector.extract_strided_slice %119 {offsets = [0, 64], sizes = [8, 32], strides = [1, 1]} : vector<8x128xf32> to vector<8x32xf32>
    %138 = math.tanh %137 : vector<8x32xf32>
    %139 = vector.extract_strided_slice %119 {offsets = [0, 96], sizes = [8, 32], strides = [1, 1]} : vector<8x128xf32> to vector<8x32xf32>
    %140 = arith.negf %139 : vector<8x32xf32>
    %141 = math.exp %140 : vector<8x32xf32>
    %cst_46 = arith.constant 1.000000e+00 : f32
    %142 = vector.broadcast %cst_46 : f32 to vector<8x32xf32>
    %143 = arith.addf %142, %141 : vector<8x32xf32>
    %144 = arith.divf %142, %143 : vector<8x32xf32>
    %145 = arith.mulf %136, %103 : vector<8x32xf32>
    %146 = arith.mulf %130, %138 : vector<8x32xf32>
    %147 = arith.addf %145, %146 : vector<8x32xf32>
    %148 = math.tanh %147 : vector<8x32xf32>
    %149 = arith.mulf %144, %148 : vector<8x32xf32>
    %150 = vector.extract_strided_slice %124 {offsets = [0, 0], sizes = [8, 32], strides = [1, 1]} : vector<8x128xf32> to vector<8x32xf32>
    %151 = arith.negf %150 : vector<8x32xf32>
    %152 = math.exp %151 : vector<8x32xf32>
    %cst_47 = arith.constant 1.000000e+00 : f32
    %153 = vector.broadcast %cst_47 : f32 to vector<8x32xf32>
    %154 = arith.addf %153, %152 : vector<8x32xf32>
    %155 = arith.divf %153, %154 : vector<8x32xf32>
    %156 = vector.extract_strided_slice %124 {offsets = [0, 32], sizes = [8, 32], strides = [1, 1]} : vector<8x128xf32> to vector<8x32xf32>
    %157 = arith.negf %156 : vector<8x32xf32>
    %158 = math.exp %157 : vector<8x32xf32>
    %cst_48 = arith.constant 1.000000e+00 : f32
    %159 = vector.broadcast %cst_48 : f32 to vector<8x32xf32>
    %160 = arith.addf %159, %158 : vector<8x32xf32>
    %161 = arith.divf %159, %160 : vector<8x32xf32>
    %162 = vector.extract_strided_slice %124 {offsets = [0, 64], sizes = [8, 32], strides = [1, 1]} : vector<8x128xf32> to vector<8x32xf32>
    %163 = math.tanh %162 : vector<8x32xf32>
    %164 = vector.extract_strided_slice %124 {offsets = [0, 96], sizes = [8, 32], strides = [1, 1]} : vector<8x128xf32> to vector<8x32xf32>
    %165 = arith.negf %164 : vector<8x32xf32>
    %166 = math.exp %165 : vector<8x32xf32>
    %cst_49 = arith.constant 1.000000e+00 : f32
    %167 = vector.broadcast %cst_49 : f32 to vector<8x32xf32>
    %168 = arith.addf %167, %166 : vector<8x32xf32>
    %169 = arith.divf %167, %168 : vector<8x32xf32>
    %170 = arith.mulf %161, %109 : vector<8x32xf32>
    %171 = arith.mulf %155, %163 : vector<8x32xf32>
    %172 = arith.addf %170, %171 : vector<8x32xf32>
    %173 = math.tanh %172 : vector<8x32xf32>
    %174 = arith.mulf %169, %173 : vector<8x32xf32>
    %cst_50 = arith.constant 0.000000e+00 : f32
    %175 = vector.shape_cast %112 : vector<8x1xi1> to vector<8x1xi1>
    %176 = vector.broadcast %175 : vector<8x1xi1> to vector<8x32xi1>
    %177 = vector.broadcast %cst_50 : f32 to vector<8x32xf32>
    %178 = arith.select %176, %149, %177 : vector<8x32xi1>, vector<8x32xf32>
    %179 = arith.index_cast %c1_i32 : i32 to index
    %c0_51 = arith.constant 0 : index
    %c0_52 = arith.constant 0 : index
    %180 = vector.load %arg7[%179, %c0_51, %c0_52] : memref<8x8x32xf32, #tpu.memory_space<vmem>>, vector<1x8x32xf32>
    %181 = vector.shape_cast %180 : vector<1x8x32xf32> to vector<8x32xf32>
    %182 = vector.shape_cast %178 : vector<8x32xf32> to vector<1x8x32xf32>
    tpu.vector_store %arg7[%179, %c0_51, %c0_52], %182 {strides = array<i32>} : memref<8x8x32xf32, #tpu.memory_space<vmem>>, vector<1x8x32xf32>,
    %cst_53 = arith.constant 0.000000e+00 : f32
    %183 = vector.shape_cast %114 : vector<8x1xi1> to vector<8x1xi1>
    %184 = vector.broadcast %183 : vector<8x1xi1> to vector<8x32xi1>
    %185 = vector.broadcast %cst_53 : f32 to vector<8x32xf32>
    %186 = arith.select %184, %174, %185 : vector<8x32xi1>, vector<8x32xf32>
    %187 = arith.index_cast %110 : i32 to index
    %c0_54 = arith.constant 0 : index
    %c0_55 = arith.constant 0 : index
    %188 = vector.load %arg8[%187, %c0_54, %c0_55] : memref<8x8x32xf32, #tpu.memory_space<vmem>>, vector<1x8x32xf32>
    %189 = vector.shape_cast %188 : vector<1x8x32xf32> to vector<8x32xf32>
    %190 = vector.shape_cast %186 : vector<8x32xf32> to vector<1x8x32xf32>
    tpu.vector_store %arg8[%187, %c0_54, %c0_55], %190 {strides = array<i32>} : memref<8x8x32xf32, #tpu.memory_space<vmem>>, vector<1x8x32xf32>,
    %191 = vector.shape_cast %112 : vector<8x1xi1> to vector<8x1xi1>
    %192 = vector.broadcast %191 : vector<8x1xi1> to vector<8x32xi1>
    %193 = arith.select %192, %149, %100 : vector<8x32xi1>, vector<8x32xf32>
    %194 = vector.shape_cast %112 : vector<8x1xi1> to vector<8x1xi1>
    %195 = vector.broadcast %194 : vector<8x1xi1> to vector<8x32xi1>
    %196 = arith.select %195, %147, %103 : vector<8x32xi1>, vector<8x32xf32>
    %197 = vector.shape_cast %114 : vector<8x1xi1> to vector<8x1xi1>
    %198 = vector.broadcast %197 : vector<8x1xi1> to vector<8x32xi1>
    %199 = arith.select %198, %174, %106 : vector<8x32xi1>, vector<8x32xf32>
    %200 = vector.shape_cast %114 : vector<8x1xi1> to vector<8x1xi1>
    %201 = vector.broadcast %200 : vector<8x1xi1> to vector<8x32xi1>
    %202 = arith.select %201, %172, %109 : vector<8x32xi1>, vector<8x32xf32>
    %c2_i32 = arith.constant 2 : i32
    %c7_i32_56 = arith.constant 7 : i32
    %203 = arith.subi %c7_i32_56, %c2_i32 : i32
    %204 = vector.broadcast %c2_i32 : i32 to vector<8x1xi32>
    %205 = arith.cmpi slt, %204, %0 : vector<8x1xi32>
    %206 = vector.broadcast %203 : i32 to vector<8x1xi32>
    %207 = arith.cmpi slt, %206, %0 : vector<8x1xi32>
    %208 = arith.index_cast %c2_i32 : i32 to index
    %c0_57 = arith.constant 0 : index
    %c0_58 = arith.constant 0 : index
    %209 = vector.load %arg10[%208, %c0_57, %c0_58] : memref<8x8x128xf32, #tpu.memory_space<vmem>>, vector<1x8x128xf32>
    %210 = vector.shape_cast %209 : vector<1x8x128xf32> to vector<8x128xf32>
    %cst_59 = arith.constant dense<0.000000e+00> : vector<8x128xf32>
    %211 = tpu.matmul %193, %14, %cst_59 {dimension_numbers = #tpu.dot_dimension_numbers<[1], [0], [0], [1], [0, 0, 1, 1], [], []>} : vector<8x32xf32>, vector<32x128xf32>, vector<8x128xf32> -> vector<8x128xf32>
    %212 = arith.addf %210, %211 : vector<8x128xf32>
    %213 = arith.index_cast %203 : i32 to index
    %c0_60 = arith.constant 0 : index
    %c0_61 = arith.constant 0 : index
    %214 = vector.load %arg11[%213, %c0_60, %c0_61] : memref<8x8x128xf32, #tpu.memory_space<vmem>>, vector<1x8x128xf32>
    %215 = vector.shape_cast %214 : vector<1x8x128xf32> to vector<8x128xf32>
    %cst_62 = arith.constant dense<0.000000e+00> : vector<8x128xf32>
    %216 = tpu.matmul %199, %15, %cst_62 {dimension_numbers = #tpu.dot_dimension_numbers<[1], [0], [0], [1], [0, 0, 1, 1], [], []>} : vector<8x32xf32>, vector<32x128xf32>, vector<8x128xf32> -> vector<8x128xf32>
    %217 = arith.addf %215, %216 : vector<8x128xf32>
    %218 = vector.extract_strided_slice %212 {offsets = [0, 0], sizes = [8, 32], strides = [1, 1]} : vector<8x128xf32> to vector<8x32xf32>
    %219 = arith.negf %218 : vector<8x32xf32>
    %220 = math.exp %219 : vector<8x32xf32>
    %cst_63 = arith.constant 1.000000e+00 : f32
    %221 = vector.broadcast %cst_63 : f32 to vector<8x32xf32>
    %222 = arith.addf %221, %220 : vector<8x32xf32>
    %223 = arith.divf %221, %222 : vector<8x32xf32>
    %224 = vector.extract_strided_slice %212 {offsets = [0, 32], sizes = [8, 32], strides = [1, 1]} : vector<8x128xf32> to vector<8x32xf32>
    %225 = arith.negf %224 : vector<8x32xf32>
    %226 = math.exp %225 : vector<8x32xf32>
    %cst_64 = arith.constant 1.000000e+00 : f32
    %227 = vector.broadcast %cst_64 : f32 to vector<8x32xf32>
    %228 = arith.addf %227, %226 : vector<8x32xf32>
    %229 = arith.divf %227, %228 : vector<8x32xf32>
    %230 = vector.extract_strided_slice %212 {offsets = [0, 64], sizes = [8, 32], strides = [1, 1]} : vector<8x128xf32> to vector<8x32xf32>
    %231 = math.tanh %230 : vector<8x32xf32>
    %232 = vector.extract_strided_slice %212 {offsets = [0, 96], sizes = [8, 32], strides = [1, 1]} : vector<8x128xf32> to vector<8x32xf32>
    %233 = arith.negf %232 : vector<8x32xf32>
    %234 = math.exp %233 : vector<8x32xf32>
    %cst_65 = arith.constant 1.000000e+00 : f32
    %235 = vector.broadcast %cst_65 : f32 to vector<8x32xf32>
    %236 = arith.addf %235, %234 : vector<8x32xf32>
    %237 = arith.divf %235, %236 : vector<8x32xf32>
    %238 = arith.mulf %229, %196 : vector<8x32xf32>
    %239 = arith.mulf %223, %231 : vector<8x32xf32>
    %240 = arith.addf %238, %239 : vector<8x32xf32>
    %241 = math.tanh %240 : vector<8x32xf32>
    %242 = arith.mulf %237, %241 : vector<8x32xf32>
    %243 = vector.extract_strided_slice %217 {offsets = [0, 0], sizes = [8, 32], strides = [1, 1]} : vector<8x128xf32> to vector<8x32xf32>
    %244 = arith.negf %243 : vector<8x32xf32>
    %245 = math.exp %244 : vector<8x32xf32>
    %cst_66 = arith.constant 1.000000e+00 : f32
    %246 = vector.broadcast %cst_66 : f32 to vector<8x32xf32>
    %247 = arith.addf %246, %245 : vector<8x32xf32>
    %248 = arith.divf %246, %247 : vector<8x32xf32>
    %249 = vector.extract_strided_slice %217 {offsets = [0, 32], sizes = [8, 32], strides = [1, 1]} : vector<8x128xf32> to vector<8x32xf32>
    %250 = arith.negf %249 : vector<8x32xf32>
    %251 = math.exp %250 : vector<8x32xf32>
    %cst_67 = arith.constant 1.000000e+00 : f32
    %252 = vector.broadcast %cst_67 : f32 to vector<8x32xf32>
    %253 = arith.addf %252, %251 : vector<8x32xf32>
    %254 = arith.divf %252, %253 : vector<8x32xf32>
    %255 = vector.extract_strided_slice %217 {offsets = [0, 64], sizes = [8, 32], strides = [1, 1]} : vector<8x128xf32> to vector<8x32xf32>
    %256 = math.tanh %255 : vector<8x32xf32>
    %257 = vector.extract_strided_slice %217 {offsets = [0, 96], sizes = [8, 32], strides = [1, 1]} : vector<8x128xf32> to vector<8x32xf32>
    %258 = arith.negf %257 : vector<8x32xf32>
    %259 = math.exp %258 : vector<8x32xf32>
    %cst_68 = arith.constant 1.000000e+00 : f32
    %260 = vector.broadcast %cst_68 : f32 to vector<8x32xf32>
    %261 = arith.addf %260, %259 : vector<8x32xf32>
    %262 = arith.divf %260, %261 : vector<8x32xf32>
    %263 = arith.mulf %254, %202 : vector<8x32xf32>
    %264 = arith.mulf %248, %256 : vector<8x32xf32>
    %265 = arith.addf %263, %264 : vector<8x32xf32>
    %266 = math.tanh %265 : vector<8x32xf32>
    %267 = arith.mulf %262, %266 : vector<8x32xf32>
    %cst_69 = arith.constant 0.000000e+00 : f32
    %268 = vector.shape_cast %205 : vector<8x1xi1> to vector<8x1xi1>
    %269 = vector.broadcast %268 : vector<8x1xi1> to vector<8x32xi1>
    %270 = vector.broadcast %cst_69 : f32 to vector<8x32xf32>
    %271 = arith.select %269, %242, %270 : vector<8x32xi1>, vector<8x32xf32>
    %272 = arith.index_cast %c2_i32 : i32 to index
    %c0_70 = arith.constant 0 : index
    %c0_71 = arith.constant 0 : index
    %273 = vector.load %arg7[%272, %c0_70, %c0_71] : memref<8x8x32xf32, #tpu.memory_space<vmem>>, vector<1x8x32xf32>
    %274 = vector.shape_cast %273 : vector<1x8x32xf32> to vector<8x32xf32>
    %275 = vector.shape_cast %271 : vector<8x32xf32> to vector<1x8x32xf32>
    tpu.vector_store %arg7[%272, %c0_70, %c0_71], %275 {strides = array<i32>} : memref<8x8x32xf32, #tpu.memory_space<vmem>>, vector<1x8x32xf32>,
    %cst_72 = arith.constant 0.000000e+00 : f32
    %276 = vector.shape_cast %207 : vector<8x1xi1> to vector<8x1xi1>
    %277 = vector.broadcast %276 : vector<8x1xi1> to vector<8x32xi1>
    %278 = vector.broadcast %cst_72 : f32 to vector<8x32xf32>
    %279 = arith.select %277, %267, %278 : vector<8x32xi1>, vector<8x32xf32>
    %280 = arith.index_cast %203 : i32 to index
    %c0_73 = arith.constant 0 : index
    %c0_74 = arith.constant 0 : index
    %281 = vector.load %arg8[%280, %c0_73, %c0_74] : memref<8x8x32xf32, #tpu.memory_space<vmem>>, vector<1x8x32xf32>
    %282 = vector.shape_cast %281 : vector<1x8x32xf32> to vector<8x32xf32>
    %283 = vector.shape_cast %279 : vector<8x32xf32> to vector<1x8x32xf32>
    tpu.vector_store %arg8[%280, %c0_73, %c0_74], %283 {strides = array<i32>} : memref<8x8x32xf32, #tpu.memory_space<vmem>>, vector<1x8x32xf32>,
    %284 = vector.shape_cast %205 : vector<8x1xi1> to vector<8x1xi1>
    %285 = vector.broadcast %284 : vector<8x1xi1> to vector<8x32xi1>
    %286 = arith.select %285, %242, %193 : vector<8x32xi1>, vector<8x32xf32>
    %287 = vector.shape_cast %205 : vector<8x1xi1> to vector<8x1xi1>
    %288 = vector.broadcast %287 : vector<8x1xi1> to vector<8x32xi1>
    %289 = arith.select %288, %240, %196 : vector<8x32xi1>, vector<8x32xf32>
    %290 = vector.shape_cast %207 : vector<8x1xi1> to vector<8x1xi1>
    %291 = vector.broadcast %290 : vector<8x1xi1> to vector<8x32xi1>
    %292 = arith.select %291, %267, %199 : vector<8x32xi1>, vector<8x32xf32>
    %293 = vector.shape_cast %207 : vector<8x1xi1> to vector<8x1xi1>
    %294 = vector.broadcast %293 : vector<8x1xi1> to vector<8x32xi1>
    %295 = arith.select %294, %265, %202 : vector<8x32xi1>, vector<8x32xf32>
    %c3_i32 = arith.constant 3 : i32
    %c7_i32_75 = arith.constant 7 : i32
    %296 = arith.subi %c7_i32_75, %c3_i32 : i32
    %297 = vector.broadcast %c3_i32 : i32 to vector<8x1xi32>
    %298 = arith.cmpi slt, %297, %0 : vector<8x1xi32>
    %299 = vector.broadcast %296 : i32 to vector<8x1xi32>
    %300 = arith.cmpi slt, %299, %0 : vector<8x1xi32>
    %301 = arith.index_cast %c3_i32 : i32 to index
    %c0_76 = arith.constant 0 : index
    %c0_77 = arith.constant 0 : index
    %302 = vector.load %arg10[%301, %c0_76, %c0_77] : memref<8x8x128xf32, #tpu.memory_space<vmem>>, vector<1x8x128xf32>
    %303 = vector.shape_cast %302 : vector<1x8x128xf32> to vector<8x128xf32>
    %cst_78 = arith.constant dense<0.000000e+00> : vector<8x128xf32>
    %304 = tpu.matmul %286, %14, %cst_78 {dimension_numbers = #tpu.dot_dimension_numbers<[1], [0], [0], [1], [0, 0, 1, 1], [], []>} : vector<8x32xf32>, vector<32x128xf32>, vector<8x128xf32> -> vector<8x128xf32>
    %305 = arith.addf %303, %304 : vector<8x128xf32>
    %306 = arith.index_cast %296 : i32 to index
    %c0_79 = arith.constant 0 : index
    %c0_80 = arith.constant 0 : index
    %307 = vector.load %arg11[%306, %c0_79, %c0_80] : memref<8x8x128xf32, #tpu.memory_space<vmem>>, vector<1x8x128xf32>
    %308 = vector.shape_cast %307 : vector<1x8x128xf32> to vector<8x128xf32>
    %cst_81 = arith.constant dense<0.000000e+00> : vector<8x128xf32>
    %309 = tpu.matmul %292, %15, %cst_81 {dimension_numbers = #tpu.dot_dimension_numbers<[1], [0], [0], [1], [0, 0, 1, 1], [], []>} : vector<8x32xf32>, vector<32x128xf32>, vector<8x128xf32> -> vector<8x128xf32>
    %310 = arith.addf %308, %309 : vector<8x128xf32>
    %311 = vector.extract_strided_slice %305 {offsets = [0, 0], sizes = [8, 32], strides = [1, 1]} : vector<8x128xf32> to vector<8x32xf32>
    %312 = arith.negf %311 : vector<8x32xf32>
    %313 = math.exp %312 : vector<8x32xf32>
    %cst_82 = arith.constant 1.000000e+00 : f32
    %314 = vector.broadcast %cst_82 : f32 to vector<8x32xf32>
    %315 = arith.addf %314, %313 : vector<8x32xf32>
    %316 = arith.divf %314, %315 : vector<8x32xf32>
    %317 = vector.extract_strided_slice %305 {offsets = [0, 32], sizes = [8, 32], strides = [1, 1]} : vector<8x128xf32> to vector<8x32xf32>
    %318 = arith.negf %317 : vector<8x32xf32>
    %319 = math.exp %318 : vector<8x32xf32>
    %cst_83 = arith.constant 1.000000e+00 : f32
    %320 = vector.broadcast %cst_83 : f32 to vector<8x32xf32>
    %321 = arith.addf %320, %319 : vector<8x32xf32>
    %322 = arith.divf %320, %321 : vector<8x32xf32>
    %323 = vector.extract_strided_slice %305 {offsets = [0, 64], sizes = [8, 32], strides = [1, 1]} : vector<8x128xf32> to vector<8x32xf32>
    %324 = math.tanh %323 : vector<8x32xf32>
    %325 = vector.extract_strided_slice %305 {offsets = [0, 96], sizes = [8, 32], strides = [1, 1]} : vector<8x128xf32> to vector<8x32xf32>
    %326 = arith.negf %325 : vector<8x32xf32>
    %327 = math.exp %326 : vector<8x32xf32>
    %cst_84 = arith.constant 1.000000e+00 : f32
    %328 = vector.broadcast %cst_84 : f32 to vector<8x32xf32>
    %329 = arith.addf %328, %327 : vector<8x32xf32>
    %330 = arith.divf %328, %329 : vector<8x32xf32>
    %331 = arith.mulf %322, %289 : vector<8x32xf32>
    %332 = arith.mulf %316, %324 : vector<8x32xf32>
    %333 = arith.addf %331, %332 : vector<8x32xf32>
    %334 = math.tanh %333 : vector<8x32xf32>
    %335 = arith.mulf %330, %334 : vector<8x32xf32>
    %336 = vector.extract_strided_slice %310 {offsets = [0, 0], sizes = [8, 32], strides = [1, 1]} : vector<8x128xf32> to vector<8x32xf32>
    %337 = arith.negf %336 : vector<8x32xf32>
    %338 = math.exp %337 : vector<8x32xf32>
    %cst_85 = arith.constant 1.000000e+00 : f32
    %339 = vector.broadcast %cst_85 : f32 to vector<8x32xf32>
    %340 = arith.addf %339, %338 : vector<8x32xf32>
    %341 = arith.divf %339, %340 : vector<8x32xf32>
    %342 = vector.extract_strided_slice %310 {offsets = [0, 32], sizes = [8, 32], strides = [1, 1]} : vector<8x128xf32> to vector<8x32xf32>
    %343 = arith.negf %342 : vector<8x32xf32>
    %344 = math.exp %343 : vector<8x32xf32>
    %cst_86 = arith.constant 1.000000e+00 : f32
    %345 = vector.broadcast %cst_86 : f32 to vector<8x32xf32>
    %346 = arith.addf %345, %344 : vector<8x32xf32>
    %347 = arith.divf %345, %346 : vector<8x32xf32>
    %348 = vector.extract_strided_slice %310 {offsets = [0, 64], sizes = [8, 32], strides = [1, 1]} : vector<8x128xf32> to vector<8x32xf32>
    %349 = math.tanh %348 : vector<8x32xf32>
    %350 = vector.extract_strided_slice %310 {offsets = [0, 96], sizes = [8, 32], strides = [1, 1]} : vector<8x128xf32> to vector<8x32xf32>
    %351 = arith.negf %350 : vector<8x32xf32>
    %352 = math.exp %351 : vector<8x32xf32>
    %cst_87 = arith.constant 1.000000e+00 : f32
    %353 = vector.broadcast %cst_87 : f32 to vector<8x32xf32>
    %354 = arith.addf %353, %352 : vector<8x32xf32>
    %355 = arith.divf %353, %354 : vector<8x32xf32>
    %356 = arith.mulf %347, %295 : vector<8x32xf32>
    %357 = arith.mulf %341, %349 : vector<8x32xf32>
    %358 = arith.addf %356, %357 : vector<8x32xf32>
    %359 = math.tanh %358 : vector<8x32xf32>
    %360 = arith.mulf %355, %359 : vector<8x32xf32>
    %cst_88 = arith.constant 0.000000e+00 : f32
    %361 = vector.shape_cast %298 : vector<8x1xi1> to vector<8x1xi1>
    %362 = vector.broadcast %361 : vector<8x1xi1> to vector<8x32xi1>
    %363 = vector.broadcast %cst_88 : f32 to vector<8x32xf32>
    %364 = arith.select %362, %335, %363 : vector<8x32xi1>, vector<8x32xf32>
    %365 = arith.index_cast %c3_i32 : i32 to index
    %c0_89 = arith.constant 0 : index
    %c0_90 = arith.constant 0 : index
    %366 = vector.load %arg7[%365, %c0_89, %c0_90] : memref<8x8x32xf32, #tpu.memory_space<vmem>>, vector<1x8x32xf32>
    %367 = vector.shape_cast %366 : vector<1x8x32xf32> to vector<8x32xf32>
    %368 = vector.shape_cast %364 : vector<8x32xf32> to vector<1x8x32xf32>
    tpu.vector_store %arg7[%365, %c0_89, %c0_90], %368 {strides = array<i32>} : memref<8x8x32xf32, #tpu.memory_space<vmem>>, vector<1x8x32xf32>,
    %cst_91 = arith.constant 0.000000e+00 : f32
    %369 = vector.shape_cast %300 : vector<8x1xi1> to vector<8x1xi1>
    %370 = vector.broadcast %369 : vector<8x1xi1> to vector<8x32xi1>
    %371 = vector.broadcast %cst_91 : f32 to vector<8x32xf32>
    %372 = arith.select %370, %360, %371 : vector<8x32xi1>, vector<8x32xf32>
    %373 = arith.index_cast %296 : i32 to index
    %c0_92 = arith.constant 0 : index
    %c0_93 = arith.constant 0 : index
    %374 = vector.load %arg8[%373, %c0_92, %c0_93] : memref<8x8x32xf32, #tpu.memory_space<vmem>>, vector<1x8x32xf32>
    %375 = vector.shape_cast %374 : vector<1x8x32xf32> to vector<8x32xf32>
    %376 = vector.shape_cast %372 : vector<8x32xf32> to vector<1x8x32xf32>
    tpu.vector_store %arg8[%373, %c0_92, %c0_93], %376 {strides = array<i32>} : memref<8x8x32xf32, #tpu.memory_space<vmem>>, vector<1x8x32xf32>,
    %377 = vector.shape_cast %298 : vector<8x1xi1> to vector<8x1xi1>
    %378 = vector.broadcast %377 : vector<8x1xi1> to vector<8x32xi1>
    %379 = arith.select %378, %335, %286 : vector<8x32xi1>, vector<8x32xf32>
    %380 = vector.shape_cast %298 : vector<8x1xi1> to vector<8x1xi1>
    %381 = vector.broadcast %380 : vector<8x1xi1> to vector<8x32xi1>
    %382 = arith.select %381, %333, %289 : vector<8x32xi1>, vector<8x32xf32>
    %383 = vector.shape_cast %300 : vector<8x1xi1> to vector<8x1xi1>
    %384 = vector.broadcast %383 : vector<8x1xi1> to vector<8x32xi1>
    %385 = arith.select %384, %360, %292 : vector<8x32xi1>, vector<8x32xf32>
    %386 = vector.shape_cast %300 : vector<8x1xi1> to vector<8x1xi1>
    %387 = vector.broadcast %386 : vector<8x1xi1> to vector<8x32xi1>
    %388 = arith.select %387, %358, %295 : vector<8x32xi1>, vector<8x32xf32>
    %c4_i32 = arith.constant 4 : i32
    %c7_i32_94 = arith.constant 7 : i32
    %389 = arith.subi %c7_i32_94, %c4_i32 : i32
    %390 = vector.broadcast %c4_i32 : i32 to vector<8x1xi32>
    %391 = arith.cmpi slt, %390, %0 : vector<8x1xi32>
    %392 = vector.broadcast %389 : i32 to vector<8x1xi32>
    %393 = arith.cmpi slt, %392, %0 : vector<8x1xi32>
    %394 = arith.index_cast %c4_i32 : i32 to index
    %c0_95 = arith.constant 0 : index
    %c0_96 = arith.constant 0 : index
    %395 = vector.load %arg10[%394, %c0_95, %c0_96] : memref<8x8x128xf32, #tpu.memory_space<vmem>>, vector<1x8x128xf32>
    %396 = vector.shape_cast %395 : vector<1x8x128xf32> to vector<8x128xf32>
    %cst_97 = arith.constant dense<0.000000e+00> : vector<8x128xf32>
    %397 = tpu.matmul %379, %14, %cst_97 {dimension_numbers = #tpu.dot_dimension_numbers<[1], [0], [0], [1], [0, 0, 1, 1], [], []>} : vector<8x32xf32>, vector<32x128xf32>, vector<8x128xf32> -> vector<8x128xf32>
    %398 = arith.addf %396, %397 : vector<8x128xf32>
    %399 = arith.index_cast %389 : i32 to index
    %c0_98 = arith.constant 0 : index
    %c0_99 = arith.constant 0 : index
    %400 = vector.load %arg11[%399, %c0_98, %c0_99] : memref<8x8x128xf32, #tpu.memory_space<vmem>>, vector<1x8x128xf32>
    %401 = vector.shape_cast %400 : vector<1x8x128xf32> to vector<8x128xf32>
    %cst_100 = arith.constant dense<0.000000e+00> : vector<8x128xf32>
    %402 = tpu.matmul %385, %15, %cst_100 {dimension_numbers = #tpu.dot_dimension_numbers<[1], [0], [0], [1], [0, 0, 1, 1], [], []>} : vector<8x32xf32>, vector<32x128xf32>, vector<8x128xf32> -> vector<8x128xf32>
    %403 = arith.addf %401, %402 : vector<8x128xf32>
    %404 = vector.extract_strided_slice %398 {offsets = [0, 0], sizes = [8, 32], strides = [1, 1]} : vector<8x128xf32> to vector<8x32xf32>
    %405 = arith.negf %404 : vector<8x32xf32>
    %406 = math.exp %405 : vector<8x32xf32>
    %cst_101 = arith.constant 1.000000e+00 : f32
    %407 = vector.broadcast %cst_101 : f32 to vector<8x32xf32>
    %408 = arith.addf %407, %406 : vector<8x32xf32>
    %409 = arith.divf %407, %408 : vector<8x32xf32>
    %410 = vector.extract_strided_slice %398 {offsets = [0, 32], sizes = [8, 32], strides = [1, 1]} : vector<8x128xf32> to vector<8x32xf32>
    %411 = arith.negf %410 : vector<8x32xf32>
    %412 = math.exp %411 : vector<8x32xf32>
    %cst_102 = arith.constant 1.000000e+00 : f32
    %413 = vector.broadcast %cst_102 : f32 to vector<8x32xf32>
    %414 = arith.addf %413, %412 : vector<8x32xf32>
    %415 = arith.divf %413, %414 : vector<8x32xf32>
    %416 = vector.extract_strided_slice %398 {offsets = [0, 64], sizes = [8, 32], strides = [1, 1]} : vector<8x128xf32> to vector<8x32xf32>
    %417 = math.tanh %416 : vector<8x32xf32>
    %418 = vector.extract_strided_slice %398 {offsets = [0, 96], sizes = [8, 32], strides = [1, 1]} : vector<8x128xf32> to vector<8x32xf32>
    %419 = arith.negf %418 : vector<8x32xf32>
    %420 = math.exp %419 : vector<8x32xf32>
    %cst_103 = arith.constant 1.000000e+00 : f32
    %421 = vector.broadcast %cst_103 : f32 to vector<8x32xf32>
    %422 = arith.addf %421, %420 : vector<8x32xf32>
    %423 = arith.divf %421, %422 : vector<8x32xf32>
    %424 = arith.mulf %415, %382 : vector<8x32xf32>
    %425 = arith.mulf %409, %417 : vector<8x32xf32>
    %426 = arith.addf %424, %425 : vector<8x32xf32>
    %427 = math.tanh %426 : vector<8x32xf32>
    %428 = arith.mulf %423, %427 : vector<8x32xf32>
    %429 = vector.extract_strided_slice %403 {offsets = [0, 0], sizes = [8, 32], strides = [1, 1]} : vector<8x128xf32> to vector<8x32xf32>
    %430 = arith.negf %429 : vector<8x32xf32>
    %431 = math.exp %430 : vector<8x32xf32>
    %cst_104 = arith.constant 1.000000e+00 : f32
    %432 = vector.broadcast %cst_104 : f32 to vector<8x32xf32>
    %433 = arith.addf %432, %431 : vector<8x32xf32>
    %434 = arith.divf %432, %433 : vector<8x32xf32>
    %435 = vector.extract_strided_slice %403 {offsets = [0, 32], sizes = [8, 32], strides = [1, 1]} : vector<8x128xf32> to vector<8x32xf32>
    %436 = arith.negf %435 : vector<8x32xf32>
    %437 = math.exp %436 : vector<8x32xf32>
    %cst_105 = arith.constant 1.000000e+00 : f32
    %438 = vector.broadcast %cst_105 : f32 to vector<8x32xf32>
    %439 = arith.addf %438, %437 : vector<8x32xf32>
    %440 = arith.divf %438, %439 : vector<8x32xf32>
    %441 = vector.extract_strided_slice %403 {offsets = [0, 64], sizes = [8, 32], strides = [1, 1]} : vector<8x128xf32> to vector<8x32xf32>
    %442 = math.tanh %441 : vector<8x32xf32>
    %443 = vector.extract_strided_slice %403 {offsets = [0, 96], sizes = [8, 32], strides = [1, 1]} : vector<8x128xf32> to vector<8x32xf32>
    %444 = arith.negf %443 : vector<8x32xf32>
    %445 = math.exp %444 : vector<8x32xf32>
    %cst_106 = arith.constant 1.000000e+00 : f32
    %446 = vector.broadcast %cst_106 : f32 to vector<8x32xf32>
    %447 = arith.addf %446, %445 : vector<8x32xf32>
    %448 = arith.divf %446, %447 : vector<8x32xf32>
    %449 = arith.mulf %440, %388 : vector<8x32xf32>
    %450 = arith.mulf %434, %442 : vector<8x32xf32>
    %451 = arith.addf %449, %450 : vector<8x32xf32>
    %452 = math.tanh %451 : vector<8x32xf32>
    %453 = arith.mulf %448, %452 : vector<8x32xf32>
    %cst_107 = arith.constant 0.000000e+00 : f32
    %454 = vector.shape_cast %391 : vector<8x1xi1> to vector<8x1xi1>
    %455 = vector.broadcast %454 : vector<8x1xi1> to vector<8x32xi1>
    %456 = vector.broadcast %cst_107 : f32 to vector<8x32xf32>
    %457 = arith.select %455, %428, %456 : vector<8x32xi1>, vector<8x32xf32>
    %458 = arith.index_cast %c4_i32 : i32 to index
    %c0_108 = arith.constant 0 : index
    %c0_109 = arith.constant 0 : index
    %459 = vector.load %arg7[%458, %c0_108, %c0_109] : memref<8x8x32xf32, #tpu.memory_space<vmem>>, vector<1x8x32xf32>
    %460 = vector.shape_cast %459 : vector<1x8x32xf32> to vector<8x32xf32>
    %461 = vector.shape_cast %457 : vector<8x32xf32> to vector<1x8x32xf32>
    tpu.vector_store %arg7[%458, %c0_108, %c0_109], %461 {strides = array<i32>} : memref<8x8x32xf32, #tpu.memory_space<vmem>>, vector<1x8x32xf32>,
    %cst_110 = arith.constant 0.000000e+00 : f32
    %462 = vector.shape_cast %393 : vector<8x1xi1> to vector<8x1xi1>
    %463 = vector.broadcast %462 : vector<8x1xi1> to vector<8x32xi1>
    %464 = vector.broadcast %cst_110 : f32 to vector<8x32xf32>
    %465 = arith.select %463, %453, %464 : vector<8x32xi1>, vector<8x32xf32>
    %466 = arith.index_cast %389 : i32 to index
    %c0_111 = arith.constant 0 : index
    %c0_112 = arith.constant 0 : index
    %467 = vector.load %arg8[%466, %c0_111, %c0_112] : memref<8x8x32xf32, #tpu.memory_space<vmem>>, vector<1x8x32xf32>
    %468 = vector.shape_cast %467 : vector<1x8x32xf32> to vector<8x32xf32>
    %469 = vector.shape_cast %465 : vector<8x32xf32> to vector<1x8x32xf32>
    tpu.vector_store %arg8[%466, %c0_111, %c0_112], %469 {strides = array<i32>} : memref<8x8x32xf32, #tpu.memory_space<vmem>>, vector<1x8x32xf32>,
    %470 = vector.shape_cast %391 : vector<8x1xi1> to vector<8x1xi1>
    %471 = vector.broadcast %470 : vector<8x1xi1> to vector<8x32xi1>
    %472 = arith.select %471, %428, %379 : vector<8x32xi1>, vector<8x32xf32>
    %473 = vector.shape_cast %391 : vector<8x1xi1> to vector<8x1xi1>
    %474 = vector.broadcast %473 : vector<8x1xi1> to vector<8x32xi1>
    %475 = arith.select %474, %426, %382 : vector<8x32xi1>, vector<8x32xf32>
    %476 = vector.shape_cast %393 : vector<8x1xi1> to vector<8x1xi1>
    %477 = vector.broadcast %476 : vector<8x1xi1> to vector<8x32xi1>
    %478 = arith.select %477, %453, %385 : vector<8x32xi1>, vector<8x32xf32>
    %479 = vector.shape_cast %393 : vector<8x1xi1> to vector<8x1xi1>
    %480 = vector.broadcast %479 : vector<8x1xi1> to vector<8x32xi1>
    %481 = arith.select %480, %451, %388 : vector<8x32xi1>, vector<8x32xf32>
    %c5_i32 = arith.constant 5 : i32
    %c7_i32_113 = arith.constant 7 : i32
    %482 = arith.subi %c7_i32_113, %c5_i32 : i32
    %483 = vector.broadcast %c5_i32 : i32 to vector<8x1xi32>
    %484 = arith.cmpi slt, %483, %0 : vector<8x1xi32>
    %485 = vector.broadcast %482 : i32 to vector<8x1xi32>
    %486 = arith.cmpi slt, %485, %0 : vector<8x1xi32>
    %487 = arith.index_cast %c5_i32 : i32 to index
    %c0_114 = arith.constant 0 : index
    %c0_115 = arith.constant 0 : index
    %488 = vector.load %arg10[%487, %c0_114, %c0_115] : memref<8x8x128xf32, #tpu.memory_space<vmem>>, vector<1x8x128xf32>
    %489 = vector.shape_cast %488 : vector<1x8x128xf32> to vector<8x128xf32>
    %cst_116 = arith.constant dense<0.000000e+00> : vector<8x128xf32>
    %490 = tpu.matmul %472, %14, %cst_116 {dimension_numbers = #tpu.dot_dimension_numbers<[1], [0], [0], [1], [0, 0, 1, 1], [], []>} : vector<8x32xf32>, vector<32x128xf32>, vector<8x128xf32> -> vector<8x128xf32>
    %491 = arith.addf %489, %490 : vector<8x128xf32>
    %492 = arith.index_cast %482 : i32 to index
    %c0_117 = arith.constant 0 : index
    %c0_118 = arith.constant 0 : index
    %493 = vector.load %arg11[%492, %c0_117, %c0_118] : memref<8x8x128xf32, #tpu.memory_space<vmem>>, vector<1x8x128xf32>
    %494 = vector.shape_cast %493 : vector<1x8x128xf32> to vector<8x128xf32>
    %cst_119 = arith.constant dense<0.000000e+00> : vector<8x128xf32>
    %495 = tpu.matmul %478, %15, %cst_119 {dimension_numbers = #tpu.dot_dimension_numbers<[1], [0], [0], [1], [0, 0, 1, 1], [], []>} : vector<8x32xf32>, vector<32x128xf32>, vector<8x128xf32> -> vector<8x128xf32>
    %496 = arith.addf %494, %495 : vector<8x128xf32>
    %497 = vector.extract_strided_slice %491 {offsets = [0, 0], sizes = [8, 32], strides = [1, 1]} : vector<8x128xf32> to vector<8x32xf32>
    %498 = arith.negf %497 : vector<8x32xf32>
    %499 = math.exp %498 : vector<8x32xf32>
    %cst_120 = arith.constant 1.000000e+00 : f32
    %500 = vector.broadcast %cst_120 : f32 to vector<8x32xf32>
    %501 = arith.addf %500, %499 : vector<8x32xf32>
    %502 = arith.divf %500, %501 : vector<8x32xf32>
    %503 = vector.extract_strided_slice %491 {offsets = [0, 32], sizes = [8, 32], strides = [1, 1]} : vector<8x128xf32> to vector<8x32xf32>
    %504 = arith.negf %503 : vector<8x32xf32>
    %505 = math.exp %504 : vector<8x32xf32>
    %cst_121 = arith.constant 1.000000e+00 : f32
    %506 = vector.broadcast %cst_121 : f32 to vector<8x32xf32>
    %507 = arith.addf %506, %505 : vector<8x32xf32>
    %508 = arith.divf %506, %507 : vector<8x32xf32>
    %509 = vector.extract_strided_slice %491 {offsets = [0, 64], sizes = [8, 32], strides = [1, 1]} : vector<8x128xf32> to vector<8x32xf32>
    %510 = math.tanh %509 : vector<8x32xf32>
    %511 = vector.extract_strided_slice %491 {offsets = [0, 96], sizes = [8, 32], strides = [1, 1]} : vector<8x128xf32> to vector<8x32xf32>
    %512 = arith.negf %511 : vector<8x32xf32>
    %513 = math.exp %512 : vector<8x32xf32>
    %cst_122 = arith.constant 1.000000e+00 : f32
    %514 = vector.broadcast %cst_122 : f32 to vector<8x32xf32>
    %515 = arith.addf %514, %513 : vector<8x32xf32>
    %516 = arith.divf %514, %515 : vector<8x32xf32>
    %517 = arith.mulf %508, %475 : vector<8x32xf32>
    %518 = arith.mulf %502, %510 : vector<8x32xf32>
    %519 = arith.addf %517, %518 : vector<8x32xf32>
    %520 = math.tanh %519 : vector<8x32xf32>
    %521 = arith.mulf %516, %520 : vector<8x32xf32>
    %522 = vector.extract_strided_slice %496 {offsets = [0, 0], sizes = [8, 32], strides = [1, 1]} : vector<8x128xf32> to vector<8x32xf32>
    %523 = arith.negf %522 : vector<8x32xf32>
    %524 = math.exp %523 : vector<8x32xf32>
    %cst_123 = arith.constant 1.000000e+00 : f32
    %525 = vector.broadcast %cst_123 : f32 to vector<8x32xf32>
    %526 = arith.addf %525, %524 : vector<8x32xf32>
    %527 = arith.divf %525, %526 : vector<8x32xf32>
    %528 = vector.extract_strided_slice %496 {offsets = [0, 32], sizes = [8, 32], strides = [1, 1]} : vector<8x128xf32> to vector<8x32xf32>
    %529 = arith.negf %528 : vector<8x32xf32>
    %530 = math.exp %529 : vector<8x32xf32>
    %cst_124 = arith.constant 1.000000e+00 : f32
    %531 = vector.broadcast %cst_124 : f32 to vector<8x32xf32>
    %532 = arith.addf %531, %530 : vector<8x32xf32>
    %533 = arith.divf %531, %532 : vector<8x32xf32>
    %534 = vector.extract_strided_slice %496 {offsets = [0, 64], sizes = [8, 32], strides = [1, 1]} : vector<8x128xf32> to vector<8x32xf32>
    %535 = math.tanh %534 : vector<8x32xf32>
    %536 = vector.extract_strided_slice %496 {offsets = [0, 96], sizes = [8, 32], strides = [1, 1]} : vector<8x128xf32> to vector<8x32xf32>
    %537 = arith.negf %536 : vector<8x32xf32>
    %538 = math.exp %537 : vector<8x32xf32>
    %cst_125 = arith.constant 1.000000e+00 : f32
    %539 = vector.broadcast %cst_125 : f32 to vector<8x32xf32>
    %540 = arith.addf %539, %538 : vector<8x32xf32>
    %541 = arith.divf %539, %540 : vector<8x32xf32>
    %542 = arith.mulf %533, %481 : vector<8x32xf32>
    %543 = arith.mulf %527, %535 : vector<8x32xf32>
    %544 = arith.addf %542, %543 : vector<8x32xf32>
    %545 = math.tanh %544 : vector<8x32xf32>
    %546 = arith.mulf %541, %545 : vector<8x32xf32>
    %cst_126 = arith.constant 0.000000e+00 : f32
    %547 = vector.shape_cast %484 : vector<8x1xi1> to vector<8x1xi1>
    %548 = vector.broadcast %547 : vector<8x1xi1> to vector<8x32xi1>
    %549 = vector.broadcast %cst_126 : f32 to vector<8x32xf32>
    %550 = arith.select %548, %521, %549 : vector<8x32xi1>, vector<8x32xf32>
    %551 = arith.index_cast %c5_i32 : i32 to index
    %c0_127 = arith.constant 0 : index
    %c0_128 = arith.constant 0 : index
    %552 = vector.load %arg7[%551, %c0_127, %c0_128] : memref<8x8x32xf32, #tpu.memory_space<vmem>>, vector<1x8x32xf32>
    %553 = vector.shape_cast %552 : vector<1x8x32xf32> to vector<8x32xf32>
    %554 = vector.shape_cast %550 : vector<8x32xf32> to vector<1x8x32xf32>
    tpu.vector_store %arg7[%551, %c0_127, %c0_128], %554 {strides = array<i32>} : memref<8x8x32xf32, #tpu.memory_space<vmem>>, vector<1x8x32xf32>,
    %cst_129 = arith.constant 0.000000e+00 : f32
    %555 = vector.shape_cast %486 : vector<8x1xi1> to vector<8x1xi1>
    %556 = vector.broadcast %555 : vector<8x1xi1> to vector<8x32xi1>
    %557 = vector.broadcast %cst_129 : f32 to vector<8x32xf32>
    %558 = arith.select %556, %546, %557 : vector<8x32xi1>, vector<8x32xf32>
    %559 = arith.index_cast %482 : i32 to index
    %c0_130 = arith.constant 0 : index
    %c0_131 = arith.constant 0 : index
    %560 = vector.load %arg8[%559, %c0_130, %c0_131] : memref<8x8x32xf32, #tpu.memory_space<vmem>>, vector<1x8x32xf32>
    %561 = vector.shape_cast %560 : vector<1x8x32xf32> to vector<8x32xf32>
    %562 = vector.shape_cast %558 : vector<8x32xf32> to vector<1x8x32xf32>
    tpu.vector_store %arg8[%559, %c0_130, %c0_131], %562 {strides = array<i32>} : memref<8x8x32xf32, #tpu.memory_space<vmem>>, vector<1x8x32xf32>,
    %563 = vector.shape_cast %484 : vector<8x1xi1> to vector<8x1xi1>
    %564 = vector.broadcast %563 : vector<8x1xi1> to vector<8x32xi1>
    %565 = arith.select %564, %521, %472 : vector<8x32xi1>, vector<8x32xf32>
    %566 = vector.shape_cast %484 : vector<8x1xi1> to vector<8x1xi1>
    %567 = vector.broadcast %566 : vector<8x1xi1> to vector<8x32xi1>
    %568 = arith.select %567, %519, %475 : vector<8x32xi1>, vector<8x32xf32>
    %569 = vector.shape_cast %486 : vector<8x1xi1> to vector<8x1xi1>
    %570 = vector.broadcast %569 : vector<8x1xi1> to vector<8x32xi1>
    %571 = arith.select %570, %546, %478 : vector<8x32xi1>, vector<8x32xf32>
    %572 = vector.shape_cast %486 : vector<8x1xi1> to vector<8x1xi1>
    %573 = vector.broadcast %572 : vector<8x1xi1> to vector<8x32xi1>
    %574 = arith.select %573, %544, %481 : vector<8x32xi1>, vector<8x32xf32>
    %c6_i32 = arith.constant 6 : i32
    %c7_i32_132 = arith.constant 7 : i32
    %575 = arith.subi %c7_i32_132, %c6_i32 : i32
    %576 = vector.broadcast %c6_i32 : i32 to vector<8x1xi32>
    %577 = arith.cmpi slt, %576, %0 : vector<8x1xi32>
    %578 = vector.broadcast %575 : i32 to vector<8x1xi32>
    %579 = arith.cmpi slt, %578, %0 : vector<8x1xi32>
    %580 = arith.index_cast %c6_i32 : i32 to index
    %c0_133 = arith.constant 0 : index
    %c0_134 = arith.constant 0 : index
    %581 = vector.load %arg10[%580, %c0_133, %c0_134] : memref<8x8x128xf32, #tpu.memory_space<vmem>>, vector<1x8x128xf32>
    %582 = vector.shape_cast %581 : vector<1x8x128xf32> to vector<8x128xf32>
    %cst_135 = arith.constant dense<0.000000e+00> : vector<8x128xf32>
    %583 = tpu.matmul %565, %14, %cst_135 {dimension_numbers = #tpu.dot_dimension_numbers<[1], [0], [0], [1], [0, 0, 1, 1], [], []>} : vector<8x32xf32>, vector<32x128xf32>, vector<8x128xf32> -> vector<8x128xf32>
    %584 = arith.addf %582, %583 : vector<8x128xf32>
    %585 = arith.index_cast %575 : i32 to index
    %c0_136 = arith.constant 0 : index
    %c0_137 = arith.constant 0 : index
    %586 = vector.load %arg11[%585, %c0_136, %c0_137] : memref<8x8x128xf32, #tpu.memory_space<vmem>>, vector<1x8x128xf32>
    %587 = vector.shape_cast %586 : vector<1x8x128xf32> to vector<8x128xf32>
    %cst_138 = arith.constant dense<0.000000e+00> : vector<8x128xf32>
    %588 = tpu.matmul %571, %15, %cst_138 {dimension_numbers = #tpu.dot_dimension_numbers<[1], [0], [0], [1], [0, 0, 1, 1], [], []>} : vector<8x32xf32>, vector<32x128xf32>, vector<8x128xf32> -> vector<8x128xf32>
    %589 = arith.addf %587, %588 : vector<8x128xf32>
    %590 = vector.extract_strided_slice %584 {offsets = [0, 0], sizes = [8, 32], strides = [1, 1]} : vector<8x128xf32> to vector<8x32xf32>
    %591 = arith.negf %590 : vector<8x32xf32>
    %592 = math.exp %591 : vector<8x32xf32>
    %cst_139 = arith.constant 1.000000e+00 : f32
    %593 = vector.broadcast %cst_139 : f32 to vector<8x32xf32>
    %594 = arith.addf %593, %592 : vector<8x32xf32>
    %595 = arith.divf %593, %594 : vector<8x32xf32>
    %596 = vector.extract_strided_slice %584 {offsets = [0, 32], sizes = [8, 32], strides = [1, 1]} : vector<8x128xf32> to vector<8x32xf32>
    %597 = arith.negf %596 : vector<8x32xf32>
    %598 = math.exp %597 : vector<8x32xf32>
    %cst_140 = arith.constant 1.000000e+00 : f32
    %599 = vector.broadcast %cst_140 : f32 to vector<8x32xf32>
    %600 = arith.addf %599, %598 : vector<8x32xf32>
    %601 = arith.divf %599, %600 : vector<8x32xf32>
    %602 = vector.extract_strided_slice %584 {offsets = [0, 64], sizes = [8, 32], strides = [1, 1]} : vector<8x128xf32> to vector<8x32xf32>
    %603 = math.tanh %602 : vector<8x32xf32>
    %604 = vector.extract_strided_slice %584 {offsets = [0, 96], sizes = [8, 32], strides = [1, 1]} : vector<8x128xf32> to vector<8x32xf32>
    %605 = arith.negf %604 : vector<8x32xf32>
    %606 = math.exp %605 : vector<8x32xf32>
    %cst_141 = arith.constant 1.000000e+00 : f32
    %607 = vector.broadcast %cst_141 : f32 to vector<8x32xf32>
    %608 = arith.addf %607, %606 : vector<8x32xf32>
    %609 = arith.divf %607, %608 : vector<8x32xf32>
    %610 = arith.mulf %601, %568 : vector<8x32xf32>
    %611 = arith.mulf %595, %603 : vector<8x32xf32>
    %612 = arith.addf %610, %611 : vector<8x32xf32>
    %613 = math.tanh %612 : vector<8x32xf32>
    %614 = arith.mulf %609, %613 : vector<8x32xf32>
    %615 = vector.extract_strided_slice %589 {offsets = [0, 0], sizes = [8, 32], strides = [1, 1]} : vector<8x128xf32> to vector<8x32xf32>
    %616 = arith.negf %615 : vector<8x32xf32>
    %617 = math.exp %616 : vector<8x32xf32>
    %cst_142 = arith.constant 1.000000e+00 : f32
    %618 = vector.broadcast %cst_142 : f32 to vector<8x32xf32>
    %619 = arith.addf %618, %617 : vector<8x32xf32>
    %620 = arith.divf %618, %619 : vector<8x32xf32>
    %621 = vector.extract_strided_slice %589 {offsets = [0, 32], sizes = [8, 32], strides = [1, 1]} : vector<8x128xf32> to vector<8x32xf32>
    %622 = arith.negf %621 : vector<8x32xf32>
    %623 = math.exp %622 : vector<8x32xf32>
    %cst_143 = arith.constant 1.000000e+00 : f32
    %624 = vector.broadcast %cst_143 : f32 to vector<8x32xf32>
    %625 = arith.addf %624, %623 : vector<8x32xf32>
    %626 = arith.divf %624, %625 : vector<8x32xf32>
    %627 = vector.extract_strided_slice %589 {offsets = [0, 64], sizes = [8, 32], strides = [1, 1]} : vector<8x128xf32> to vector<8x32xf32>
    %628 = math.tanh %627 : vector<8x32xf32>
    %629 = vector.extract_strided_slice %589 {offsets = [0, 96], sizes = [8, 32], strides = [1, 1]} : vector<8x128xf32> to vector<8x32xf32>
    %630 = arith.negf %629 : vector<8x32xf32>
    %631 = math.exp %630 : vector<8x32xf32>
    %cst_144 = arith.constant 1.000000e+00 : f32
    %632 = vector.broadcast %cst_144 : f32 to vector<8x32xf32>
    %633 = arith.addf %632, %631 : vector<8x32xf32>
    %634 = arith.divf %632, %633 : vector<8x32xf32>
    %635 = arith.mulf %626, %574 : vector<8x32xf32>
    %636 = arith.mulf %620, %628 : vector<8x32xf32>
    %637 = arith.addf %635, %636 : vector<8x32xf32>
    %638 = math.tanh %637 : vector<8x32xf32>
    %639 = arith.mulf %634, %638 : vector<8x32xf32>
    %cst_145 = arith.constant 0.000000e+00 : f32
    %640 = vector.shape_cast %577 : vector<8x1xi1> to vector<8x1xi1>
    %641 = vector.broadcast %640 : vector<8x1xi1> to vector<8x32xi1>
    %642 = vector.broadcast %cst_145 : f32 to vector<8x32xf32>
    %643 = arith.select %641, %614, %642 : vector<8x32xi1>, vector<8x32xf32>
    %644 = arith.index_cast %c6_i32 : i32 to index
    %c0_146 = arith.constant 0 : index
    %c0_147 = arith.constant 0 : index
    %645 = vector.load %arg7[%644, %c0_146, %c0_147] : memref<8x8x32xf32, #tpu.memory_space<vmem>>, vector<1x8x32xf32>
    %646 = vector.shape_cast %645 : vector<1x8x32xf32> to vector<8x32xf32>
    %647 = vector.shape_cast %643 : vector<8x32xf32> to vector<1x8x32xf32>
    tpu.vector_store %arg7[%644, %c0_146, %c0_147], %647 {strides = array<i32>} : memref<8x8x32xf32, #tpu.memory_space<vmem>>, vector<1x8x32xf32>,
    %cst_148 = arith.constant 0.000000e+00 : f32
    %648 = vector.shape_cast %579 : vector<8x1xi1> to vector<8x1xi1>
    %649 = vector.broadcast %648 : vector<8x1xi1> to vector<8x32xi1>
    %650 = vector.broadcast %cst_148 : f32 to vector<8x32xf32>
    %651 = arith.select %649, %639, %650 : vector<8x32xi1>, vector<8x32xf32>
    %652 = arith.index_cast %575 : i32 to index
    %c0_149 = arith.constant 0 : index
    %c0_150 = arith.constant 0 : index
    %653 = vector.load %arg8[%652, %c0_149, %c0_150] : memref<8x8x32xf32, #tpu.memory_space<vmem>>, vector<1x8x32xf32>
    %654 = vector.shape_cast %653 : vector<1x8x32xf32> to vector<8x32xf32>
    %655 = vector.shape_cast %651 : vector<8x32xf32> to vector<1x8x32xf32>
    tpu.vector_store %arg8[%652, %c0_149, %c0_150], %655 {strides = array<i32>} : memref<8x8x32xf32, #tpu.memory_space<vmem>>, vector<1x8x32xf32>,
    %656 = vector.shape_cast %577 : vector<8x1xi1> to vector<8x1xi1>
    %657 = vector.broadcast %656 : vector<8x1xi1> to vector<8x32xi1>
    %658 = arith.select %657, %614, %565 : vector<8x32xi1>, vector<8x32xf32>
    %659 = vector.shape_cast %577 : vector<8x1xi1> to vector<8x1xi1>
    %660 = vector.broadcast %659 : vector<8x1xi1> to vector<8x32xi1>
    %661 = arith.select %660, %612, %568 : vector<8x32xi1>, vector<8x32xf32>
    %662 = vector.shape_cast %579 : vector<8x1xi1> to vector<8x1xi1>
    %663 = vector.broadcast %662 : vector<8x1xi1> to vector<8x32xi1>
    %664 = arith.select %663, %639, %571 : vector<8x32xi1>, vector<8x32xf32>
    %665 = vector.shape_cast %579 : vector<8x1xi1> to vector<8x1xi1>
    %666 = vector.broadcast %665 : vector<8x1xi1> to vector<8x32xi1>
    %667 = arith.select %666, %637, %574 : vector<8x32xi1>, vector<8x32xf32>
    %c7_i32_151 = arith.constant 7 : i32
    %c7_i32_152 = arith.constant 7 : i32
    %668 = arith.subi %c7_i32_152, %c7_i32_151 : i32
    %669 = vector.broadcast %c7_i32_151 : i32 to vector<8x1xi32>
    %670 = arith.cmpi slt, %669, %0 : vector<8x1xi32>
    %671 = vector.broadcast %668 : i32 to vector<8x1xi32>
    %672 = arith.cmpi slt, %671, %0 : vector<8x1xi32>
    %673 = arith.index_cast %c7_i32_151 : i32 to index
    %c0_153 = arith.constant 0 : index
    %c0_154 = arith.constant 0 : index
    %674 = vector.load %arg10[%673, %c0_153, %c0_154] : memref<8x8x128xf32, #tpu.memory_space<vmem>>, vector<1x8x128xf32>
    %675 = vector.shape_cast %674 : vector<1x8x128xf32> to vector<8x128xf32>
    %cst_155 = arith.constant dense<0.000000e+00> : vector<8x128xf32>
    %676 = tpu.matmul %658, %14, %cst_155 {dimension_numbers = #tpu.dot_dimension_numbers<[1], [0], [0], [1], [0, 0, 1, 1], [], []>} : vector<8x32xf32>, vector<32x128xf32>, vector<8x128xf32> -> vector<8x128xf32>
    %677 = arith.addf %675, %676 : vector<8x128xf32>
    %678 = arith.index_cast %668 : i32 to index
    %c0_156 = arith.constant 0 : index
    %c0_157 = arith.constant 0 : index
    %679 = vector.load %arg11[%678, %c0_156, %c0_157] : memref<8x8x128xf32, #tpu.memory_space<vmem>>, vector<1x8x128xf32>
    %680 = vector.shape_cast %679 : vector<1x8x128xf32> to vector<8x128xf32>
    %cst_158 = arith.constant dense<0.000000e+00> : vector<8x128xf32>
    %681 = tpu.matmul %664, %15, %cst_158 {dimension_numbers = #tpu.dot_dimension_numbers<[1], [0], [0], [1], [0, 0, 1, 1], [], []>} : vector<8x32xf32>, vector<32x128xf32>, vector<8x128xf32> -> vector<8x128xf32>
    %682 = arith.addf %680, %681 : vector<8x128xf32>
    %683 = vector.extract_strided_slice %677 {offsets = [0, 0], sizes = [8, 32], strides = [1, 1]} : vector<8x128xf32> to vector<8x32xf32>
    %684 = arith.negf %683 : vector<8x32xf32>
    %685 = math.exp %684 : vector<8x32xf32>
    %cst_159 = arith.constant 1.000000e+00 : f32
    %686 = vector.broadcast %cst_159 : f32 to vector<8x32xf32>
    %687 = arith.addf %686, %685 : vector<8x32xf32>
    %688 = arith.divf %686, %687 : vector<8x32xf32>
    %689 = vector.extract_strided_slice %677 {offsets = [0, 32], sizes = [8, 32], strides = [1, 1]} : vector<8x128xf32> to vector<8x32xf32>
    %690 = arith.negf %689 : vector<8x32xf32>
    %691 = math.exp %690 : vector<8x32xf32>
    %cst_160 = arith.constant 1.000000e+00 : f32
    %692 = vector.broadcast %cst_160 : f32 to vector<8x32xf32>
    %693 = arith.addf %692, %691 : vector<8x32xf32>
    %694 = arith.divf %692, %693 : vector<8x32xf32>
    %695 = vector.extract_strided_slice %677 {offsets = [0, 64], sizes = [8, 32], strides = [1, 1]} : vector<8x128xf32> to vector<8x32xf32>
    %696 = math.tanh %695 : vector<8x32xf32>
    %697 = vector.extract_strided_slice %677 {offsets = [0, 96], sizes = [8, 32], strides = [1, 1]} : vector<8x128xf32> to vector<8x32xf32>
    %698 = arith.negf %697 : vector<8x32xf32>
    %699 = math.exp %698 : vector<8x32xf32>
    %cst_161 = arith.constant 1.000000e+00 : f32
    %700 = vector.broadcast %cst_161 : f32 to vector<8x32xf32>
    %701 = arith.addf %700, %699 : vector<8x32xf32>
    %702 = arith.divf %700, %701 : vector<8x32xf32>
    %703 = arith.mulf %694, %661 : vector<8x32xf32>
    %704 = arith.mulf %688, %696 : vector<8x32xf32>
    %705 = arith.addf %703, %704 : vector<8x32xf32>
    %706 = math.tanh %705 : vector<8x32xf32>
    %707 = arith.mulf %702, %706 : vector<8x32xf32>
    %708 = vector.extract_strided_slice %682 {offsets = [0, 0], sizes = [8, 32], strides = [1, 1]} : vector<8x128xf32> to vector<8x32xf32>
    %709 = arith.negf %708 : vector<8x32xf32>
    %710 = math.exp %709 : vector<8x32xf32>
    %cst_162 = arith.constant 1.000000e+00 : f32
    %711 = vector.broadcast %cst_162 : f32 to vector<8x32xf32>
    %712 = arith.addf %711, %710 : vector<8x32xf32>
    %713 = arith.divf %711, %712 : vector<8x32xf32>
    %714 = vector.extract_strided_slice %682 {offsets = [0, 32], sizes = [8, 32], strides = [1, 1]} : vector<8x128xf32> to vector<8x32xf32>
    %715 = arith.negf %714 : vector<8x32xf32>
    %716 = math.exp %715 : vector<8x32xf32>
    %cst_163 = arith.constant 1.000000e+00 : f32
    %717 = vector.broadcast %cst_163 : f32 to vector<8x32xf32>
    %718 = arith.addf %717, %716 : vector<8x32xf32>
    %719 = arith.divf %717, %718 : vector<8x32xf32>
    %720 = vector.extract_strided_slice %682 {offsets = [0, 64], sizes = [8, 32], strides = [1, 1]} : vector<8x128xf32> to vector<8x32xf32>
    %721 = math.tanh %720 : vector<8x32xf32>
    %722 = vector.extract_strided_slice %682 {offsets = [0, 96], sizes = [8, 32], strides = [1, 1]} : vector<8x128xf32> to vector<8x32xf32>
    %723 = arith.negf %722 : vector<8x32xf32>
    %724 = math.exp %723 : vector<8x32xf32>
    %cst_164 = arith.constant 1.000000e+00 : f32
    %725 = vector.broadcast %cst_164 : f32 to vector<8x32xf32>
    %726 = arith.addf %725, %724 : vector<8x32xf32>
    %727 = arith.divf %725, %726 : vector<8x32xf32>
    %728 = arith.mulf %719, %667 : vector<8x32xf32>
    %729 = arith.mulf %713, %721 : vector<8x32xf32>
    %730 = arith.addf %728, %729 : vector<8x32xf32>
    %731 = math.tanh %730 : vector<8x32xf32>
    %732 = arith.mulf %727, %731 : vector<8x32xf32>
    %cst_165 = arith.constant 0.000000e+00 : f32
    %733 = vector.shape_cast %670 : vector<8x1xi1> to vector<8x1xi1>
    %734 = vector.broadcast %733 : vector<8x1xi1> to vector<8x32xi1>
    %735 = vector.broadcast %cst_165 : f32 to vector<8x32xf32>
    %736 = arith.select %734, %707, %735 : vector<8x32xi1>, vector<8x32xf32>
    %737 = arith.index_cast %c7_i32_151 : i32 to index
    %c0_166 = arith.constant 0 : index
    %c0_167 = arith.constant 0 : index
    %738 = vector.load %arg7[%737, %c0_166, %c0_167] : memref<8x8x32xf32, #tpu.memory_space<vmem>>, vector<1x8x32xf32>
    %739 = vector.shape_cast %738 : vector<1x8x32xf32> to vector<8x32xf32>
    %740 = vector.shape_cast %736 : vector<8x32xf32> to vector<1x8x32xf32>
    tpu.vector_store %arg7[%737, %c0_166, %c0_167], %740 {strides = array<i32>} : memref<8x8x32xf32, #tpu.memory_space<vmem>>, vector<1x8x32xf32>,
    %cst_168 = arith.constant 0.000000e+00 : f32
    %741 = vector.shape_cast %672 : vector<8x1xi1> to vector<8x1xi1>
    %742 = vector.broadcast %741 : vector<8x1xi1> to vector<8x32xi1>
    %743 = vector.broadcast %cst_168 : f32 to vector<8x32xf32>
    %744 = arith.select %742, %732, %743 : vector<8x32xi1>, vector<8x32xf32>
    %745 = arith.index_cast %668 : i32 to index
    %c0_169 = arith.constant 0 : index
    %c0_170 = arith.constant 0 : index
    %746 = vector.load %arg8[%745, %c0_169, %c0_170] : memref<8x8x32xf32, #tpu.memory_space<vmem>>, vector<1x8x32xf32>
    %747 = vector.shape_cast %746 : vector<1x8x32xf32> to vector<8x32xf32>
    %748 = vector.shape_cast %744 : vector<8x32xf32> to vector<1x8x32xf32>
    tpu.vector_store %arg8[%745, %c0_169, %c0_170], %748 {strides = array<i32>} : memref<8x8x32xf32, #tpu.memory_space<vmem>>, vector<1x8x32xf32>,
    %749 = vector.shape_cast %670 : vector<8x1xi1> to vector<8x1xi1>
    %750 = vector.broadcast %749 : vector<8x1xi1> to vector<8x32xi1>
    %751 = arith.select %750, %707, %658 : vector<8x32xi1>, vector<8x32xf32>
    %752 = vector.shape_cast %670 : vector<8x1xi1> to vector<8x1xi1>
    %753 = vector.broadcast %752 : vector<8x1xi1> to vector<8x32xi1>
    %754 = arith.select %753, %705, %661 : vector<8x32xi1>, vector<8x32xf32>
    %755 = vector.shape_cast %672 : vector<8x1xi1> to vector<8x1xi1>
    %756 = vector.broadcast %755 : vector<8x1xi1> to vector<8x32xi1>
    %757 = arith.select %756, %732, %664 : vector<8x32xi1>, vector<8x32xf32>
    %758 = vector.shape_cast %672 : vector<8x1xi1> to vector<8x1xi1>
    %759 = vector.broadcast %758 : vector<8x1xi1> to vector<8x32xi1>
    %760 = arith.select %759, %730, %667 : vector<8x32xi1>, vector<8x32xf32>
    %c8_i32 = arith.constant 8 : i32
    %761 = tpu.concatenate %751, %757, %754, %760 in 1 : vector<8x32xf32>, vector<8x32xf32>, vector<8x32xf32>, vector<8x32xf32> -> vector<8x128xf32>
    %c0_171 = arith.constant 0 : index
    %c0_172 = arith.constant 0 : index
    %762 = vector.load %arg9[%c0_171, %c0_172] : memref<8x128xf32, #tpu.memory_space<vmem>>, vector<8x128xf32>
    tpu.vector_store %arg9[%c0_171, %c0_172], %761 {strides = array<i32>} : memref<8x128xf32, #tpu.memory_space<vmem>>, vector<8x128xf32>,
    return
  }
  func.func @transform_0(%arg0: i32) -> (i32, i32) {
    %c0_i32 = arith.constant 0 : i32
    %c0_i32_0 = arith.constant 0 : i32
    return %arg0, %c0_i32 : i32, i32
  }
  func.func @transform_1(%arg0: i32) -> (i32, i32, i32) {
    %c0_i32 = arith.constant 0 : i32
    %c0_i32_0 = arith.constant 0 : i32
    %c0_i32_1 = arith.constant 0 : i32
    return %c0_i32, %arg0, %c0_i32_0 : i32, i32, i32
  }
  func.func @transform_2(%arg0: i32) -> (i32, i32) {
    %c0_i32 = arith.constant 0 : i32
    %c0_i32_0 = arith.constant 0 : i32
    %c0_i32_1 = arith.constant 0 : i32
    return %c0_i32, %c0_i32_0 : i32, i32
  }
  func.func @transform_3(%arg0: i32) -> (i32, i32) {
    %c0_i32 = arith.constant 0 : i32
    %c0_i32_0 = arith.constant 0 : i32
    %c0_i32_1 = arith.constant 0 : i32
    return %c0_i32, %c0_i32_0 : i32, i32
  }
  func.func @transform_4(%arg0: i32) -> (i32, i32) {
    %c0_i32 = arith.constant 0 : i32
    %c0_i32_0 = arith.constant 0 : i32
    %c0_i32_1 = arith.constant 0 : i32
    return %c0_i32, %c0_i32_0 : i32, i32
  }
  func.func @transform_5(%arg0: i32) -> (i32, i32) {
    %c0_i32 = arith.constant 0 : i32
    %c0_i32_0 = arith.constant 0 : i32
    %c0_i32_1 = arith.constant 0 : i32
    return %c0_i32, %c0_i32_0 : i32, i32
  }
  func.func @transform_6(%arg0: i32) -> (i32, i32, i32) {
    %c0_i32 = arith.constant 0 : i32
    %c0_i32_0 = arith.constant 0 : i32
    %c0_i32_1 = arith.constant 0 : i32
    return %c0_i32, %arg0, %c0_i32_0 : i32, i32, i32
  }
  func.func @transform_7(%arg0: i32) -> (i32, i32, i32) {
    %c0_i32 = arith.constant 0 : i32
    %c0_i32_0 = arith.constant 0 : i32
    %c0_i32_1 = arith.constant 0 : i32
    return %c0_i32, %arg0, %c0_i32_0 : i32, i32, i32
  }
  func.func @transform_8(%arg0: i32) -> (i32, i32) {
    %c0_i32 = arith.constant 0 : i32
    %c0_i32_0 = arith.constant 0 : i32
    return %arg0, %c0_i32 : i32, i32
  }
}

</mosaic_0001>

<bundles_post_ra>
// kernel: bi_lstm_encoder_batch.1
= control target key start
LH: loop header
LB: loop body
LE: loop exit
PB: predicated region body
PF: predicated region fallthrough
CT: control target
= control target key end

     0   :  { %s3337_s27 = smov 0   ;;  %s3339_s28 = smov 0   ;;  %s4108_s0 = inlined_call_operand.vmem [shape: s32[16,1], index: 0, kind: input, shape index: {}]   ;;  %s4109_s1 = inlined_call_operand.vmem [shape: f32[8,16,16], index: 1, kind: input, shape index: {}]   ;;  %s4110_s2 = inlined_call_operand.vmem [shape: f32[16,256], index: 2, kind: input, shape index: {}]   ;;  %s4111_s3 = inlined_call_operand.vmem [shape: f32[32,128], index: 3, kind: input, shape index: {}]   ;;  %s4112_s4 = inlined_call_operand.vmem [shape: f32[32,128], index: 4, kind: input, shape index: {}]   ;;  %s4113_s5 = inlined_call_operand.vmem [shape: f32[1,256], index: 5, kind: input, shape index: {}]   ;;  %s4114_s6 = inlined_call_operand.vmem [shape: f32[8,16,32], index: 6, kind: output, shape index: {0}]   ;;  %s4115_s7 = inlined_call_operand.vmem [shape: f32[8,16,32], index: 7, kind: output, shape index: {1}]   ;;  %s4116_s8 = inlined_call_operand.vmem [shape: f32[16,128], index: 8, kind: output, shape index: {2}]  }
   0x1   :  { %s3341_s29 = smov 0  }
   0x2 LB: > { %s3353_s30 = sadd.s32 4294967295, %s3284_s29   ;;  %s3356_s9 = sadd.s32 1, %s3284_s29   ;;  %s3284_s29 = sphi %s3341_s29, %s4120_s29   ;;  %s3280_s28 = sphi %s3339_s28, %s4119_s28   ;;  %s3276_s27 = sphi %s3337_s27, %s4118_s27  }
   0x3   : > { %s49_s10 = ssub.s32 %s3284_s29, %s3356_s9  ;;  %s52_s11 = sadd.s32 1, %s3280_s28 }
   0x4   : > { %p50_p0 = scmp.eq.s32.totalorder %s49_s10, 0  ;;  %p59_p1 = scmp.ne.s32.totalorder %s3280_s28, %s3276_s27 }
   0x5   : > { %p60_p2 = scmp.eq.s32.totalorder %s3284_s29, 0  ;;  %p173_p3 = scmp.eq.s32.totalorder %s3353_s30, 1 }
   0x6   : > { %s3366_s12 = scalar_select %p50_p0, %s3280_s28, %s52_s11  }
   0x7   : > { %p61_p4 = por %p60_p2, %p59_p1  ;;  %p3368_p5 = por %p173_p3, %p59_p1 }
   0x8   : > { %p2679_p6 = scmp.ge.s32.totalorder %s3284_s29, 2 }
   0xa   : > { %259 = sbr.rel (%p2679_p6) target bundleno = 25 (0x19), region = 32 }
  0x11   : > { %269 = sbr.rel (!%p61_p4) target bundleno = 25 (0x19), region = 40  ;;  %s271_s14 = sand.u32 (%p61_p4), 1, %s3280_s28  }
  0x12   : > { %s2681_s15 = sshll.u32 (%p61_p4), %s3284_s29, 3  ;;  %s2680_s16 = sshll.u32 (%p61_p4), %s271_s14, 6 }
  0x13   : > { %s275_s19 = scalar_lea.vmem (%p61_p4), %s4109_s1, %s2681_s15  ;;  %s273_s20 = scalar_lea.vmem (%p61_p4), [#allocation4], %s2680_s16 }
  0x14   : > { %v317_v0 = vld [vmem:[%s275_s19] sm:$0xff] (%p61_p4)  ;;  %v319_v1 = vld [vmem:[%s275_s19 + $0x10] sm:$0xff] (%p61_p4) }
  0x15   : > { %v321_v2 = vld [vmem:[%s275_s19 + $0x20] sm:$0xff] (%p61_p4)  ;;  %318 = vst [vmem:[%s273_s20] sm:$0xff] (%p61_p4), %v317_v0  ;;  %320 = vst [vmem:[%s273_s20 + $0x8] sm:$0xff] (%p61_p4), %v319_v1  ;;  %v323_v3 = vld [vmem:[%s275_s19 + $0x30] sm:$0xff] (%p61_p4) }
  0x16   : > { %322 = vst [vmem:[%s273_s20 + $0x10] sm:$0xff] (%p61_p4), %v321_v2  ;;  %v325_v4 = vld [vmem:[%s275_s19 + $0x40] sm:$0xff] (%p61_p4)  ;;  %v327_v5 = vld [vmem:[%s275_s19 + $0x50] sm:$0xff] (%p61_p4)  ;;  %324 = vst [vmem:[%s273_s20 + $0x18] sm:$0xff] (%p61_p4), %v323_v3 }
  0x17   : > { %326 = vst [vmem:[%s273_s20 + $0x20] sm:$0xff] (%p61_p4), %v325_v4  ;;  %328 = vst [vmem:[%s273_s20 + $0x28] sm:$0xff] (%p61_p4), %v327_v5  ;;  %v329_v6 = vld [vmem:[%s275_s19 + $0x60] sm:$0xff] (%p61_p4)  ;;  %v331_v7 = vld [vmem:[%s275_s19 + $0x70] sm:$0xff] (%p61_p4) }
  0x18   : > { %330 = vst [vmem:[%s273_s20 + $0x30] sm:$0xff] %v329_v6  ;;  %332 = vst [vmem:[%s273_s20 + $0x38] sm:$0xff] %v331_v7 }
  0x19 PF: > { %p2682_p7 = scmp.ge.s32.totalorder %s3284_s29, 1  ;;  %p337_p8 = scmp.lt.s32.totalorder %s3284_s29, 3 }
  0x1b   : > { %p338_p9 = pnand %p2682_p7, %p337_p8 }
  0x1c   : > { %v406_v8 = vld [vmem:[%s4110_s2 + $0x8] sm:$0xff] (!%p338_p9)  ;;  %v408_v9 = vld [vmem:[%s4110_s2 + $0x18] sm:$0xff] (!%p338_p9)  ;;  %v575_v10 = vld [vmem:[%s4111_s3] sm:$0xff] (!%p338_p9)  ;;  %s344_s10 = sand.u32 (!%p338_p9), 1, %s3276_s27   ;;  %v3286_v11 = vmov (!%p338_p9), 0.0|0.0   ;;  %v3287_v16 = vmov (!%p338_p9), 0.0   ;;  %v411_v37 = vlaneseq (!%p338_p9) }
  0x1d   : > { %341 = sbr.rel (%p338_p9) target bundleno = 5703 (0x1647), region = 78  ;;  %3006 = vmatprep.subr.bf16.mxu1 (!%p338_p9), %v3286_v11  ;;  %v3002_v12 = vpack.c.bf16 (!%p338_p9), %v408_v9, %v406_v8  ;;  %v576_v13 = vld [vmem:[%s4111_s3 + $0x8] sm:$0xff] (!%p338_p9)  ;;  %v405_v14 = vld [vmem:[%s4110_s2] sm:$0xff] (!%p338_p9)  ;;  %v407_v15 = vld [vmem:[%s4110_s2 + $0x10] sm:$0xff] (!%p338_p9)  ;;  %510 = vmatprep.mubr.f32.mxu0 (!%p338_p9), %v3287_v16  ;;  %s3401_s27 = sshll.u32 (!%p338_p9), %s344_s10, 6  ;;  %vm3288_vm0 = vmmov (!%p338_p9), 0  }
  0x1e   : > { %v3403_v17 = vpack.c.bf16 (!%p338_p9), %v576_v13, %v575_v10  ;;  %v3004_v18 = vpack.c.bf16 (!%p338_p9), %v407_v15, %v405_v14  ;;  %v577_v19 = vld [vmem:[%s4111_s3 + $0x10] sm:$0xff] (!%p338_p9)  ;;  %v578_v20 = vld [vmem:[%s4111_s3 + $0x18] sm:$0xff] (!%p338_p9)  ;;  %2834 = vmatprep.mubr.msk.f32.mxu1 (!%p338_p9), %vm3288_vm0, %v3287_v16  ;;  %s3415_s22 = scalar_lea.vmem (!%p338_p9), [#allocation4], %s3401_s27  ;;  %vm421_vm1 = vcmask (!%p338_p9), 130048   ;;  %v579_v23 = vld [vmem:[%s4112_s4] sm:$0xff] (!%p338_p9)  ;;  %v3289_v36 = vmov (!%p338_p9), 0  }
  0x1f   : > { %3003 = vmatprep.subr.bf16.mxu0 (!%p338_p9), %v3002_v12  ;;  %v397_v21 = vld [vmem:[%s3415_s22] sm:$0xff] (!%p338_p9)  ;;  %v3418_v22 = vpack.c.bf16 (!%p338_p9), %v578_v20, %v577_v19  ;;  %v580_v24 = vld [vmem:[%s4112_s4 + $0x8] sm:$0xff] (!%p338_p9)  ;;  %v581_v27 = vld [vmem:[%s4112_s4 + $0x10] sm:$0xff] (!%p338_p9)  ;;  %3132 = vset.pattern.permute.xlu0 (!%p338_p9), %v3289_v36  ;;  %v412_v38 = vshrl.u32 (!%p338_p9), %v411_v37, 7  ;;  %s3290_s17 = smov (!%p338_p9), 64   ;;  %p388_p10 = scmp.lt.s32.totalorder (!%p338_p9), %s3353_s30, 1 }
  0x20   : > { %3008 = vmatpush3.bf16.msra.mxu1 (!%p338_p9), %v3403_v17  ;;  %3005 = vmatpush1.bf16.msra.mxu0 (!%p338_p9), %v3004_v18  ;;  %v398_v25 = vld [vmem:[%s3415_s22 + $0x8] sm:$0xff] (!%p338_p9)  ;;  %v3432_v26 = vpack.c.bf16 (!%p338_p9), %v580_v24, %v579_v23  ;;  %v582_v28 = vld [vmem:[%s4112_s4 + $0x18] sm:$0xff] (!%p338_p9)  ;;  %v399_v29 = vld [vmem:[%s3415_s22 + $0x10] sm:$0xff] (!%p338_p9)  ;;  %s3291_s23 = smov (!%p338_p9), 32   ;;  %vm586_vm6 = vcmask (!%p338_p9), 261120   ;;  %s3562_s24 = scalar_lea.vmem (!%p338_p9), [#allocation5], %s3401_s27 }
  0x21   : > { %3009 = vmatprep.subr.bf16.mxu1 (!%p338_p9), %v3286_v11  ;;  %3030 = vmatprep.subr.bf16.mxu0 (!%p338_p9), %v3286_v11  ;;  %v3448_v30 = vpack.c.bf16 (!%p338_p9), %v582_v28, %v581_v27  ;;  %v400_v31 = vld [vmem:[%s3415_s22 + $0x18] sm:$0xff] (!%p338_p9)  ;;  %v401_v32 = vld [vmem:[%s3415_s22 + $0x20] sm:$0xff] (!%p338_p9)  ;;  %v402_v33 = vld [vmem:[%s3415_s22 + $0x28] sm:$0xff] (!%p338_p9)  ;;  %v413_v39 = vsub.s32 (!%p338_p9), 0, %v412_v38  ;;  %v417_v41 = vsub.s32 (!%p338_p9), 1, %v412_v38  ;;  %s3574_s25 = scalar_lea.vmem (!%p338_p9), [#allocation6], %s3401_s27 }
  0x22   : > { %v403_v34 = vld [vmem:[%s3415_s22 + $0x30] sm:$0xff] (!%p338_p9)  ;;  %v404_v35 = vld [vmem:[%s3415_s22 + $0x38] sm:$0xff] (!%p338_p9)  ;;  %3133 = vset.pattern.permute.xlu1 (!%p338_p9), %v3289_v36  ;;  %v409_v40 = vld [vmem:[%s4113_s5] sm:$0x3] (!%p338_p9) }
  0x23   : > { %2688 = vmatmul.mubr.msk.f32.vlgmr.msra.gmra.mrb[0].mxu0 (!%p338_p9), %vm421_vm1, %v397_v21  ;;  %v414_v42 = vrot.slane (!%p338_p9), %v409_v40, %v413_v39  ;;  %v418_v43 = vrot.slane (!%p338_p9), %v409_v40, %v417_v41 }
  0x24   : > { %3011 = vmatpush3.bf16.msra.mxu1 %v3418_v22  ;;  %516 = vmatprep.mubr.f32.mxu0 %v3287_v16  ;;  %s3518_s18 = scalar_select %p388_p10, %s3353_s30, 1 }
  0x25   : > { %3012 = vmatprep.subr.bf16.mxu1 %v3286_v11  ;;  %3032 = vmatpush3.bf16.msra.mxu0 %v3403_v17  ;;  %s2742_s29 = sshll.u32 (%p3368_p5), %s3353_s30, 3 }
  0x26   : > { %3033 = vmatprep.subr.bf16.mxu0 %v3286_v11  ;;  %s2686_s19 = sshll.u32 %s3518_s18, 3  ;;  %s2427_s15 = scalar_lea.vmem (%p3368_p5), %s4114_s6, %s2742_s29 }
  0x27   : > { %2835 = vmatmul.mubr.f32.vlgmr.msra.gmra.mrb[0].mxu1 %v3287_v16  ;;  %2689 = vmatmul.mubr.msk.f32.gmra.mrb[2].mxu0 %vm421_vm1, %v398_v25  ;;  %s391_s22 = scalar_lea.vmem %s4108_s0, %s2686_s19  ;;  %s395_s10 = scalar_lea.vmem %s4116_s8, %s2686_s19 }
  0x28   : > { %522 = vmatprep.mubr.f32.mxu0 %v3287_v16  ;;  %3014 = vmatpush3.bf16.msra.mxu1 %v3432_v26  ;;  %v3526_v23 = vld [vmem:[%s391_s22] sm:$0xff] }
  0x29   : > { %3015 = vmatprep.subr.bf16.mxu1 %v3286_v11  ;;  %2845 = vmatprep.mubr.msk.f32.mxu1 %vm3288_vm0, %v3287_v16  ;;  %vm583_vm2 = vcmp.gt.s32.totalorder %v3526_v23, 0  ;;  %vm584_vm3 = vcmp.gt.s32.totalorder %v3526_v23, 7  ;;  %vm807_vm7 = vcmp.gt.s32.totalorder %v3526_v23, 1  ;;  %vm808_vm8 = vcmp.gt.s32.totalorder %v3526_v23, 6 }
  0x2a   : > { %3035 = vmatpush3.bf16.msra.mxu0 %v3418_v22  ;;  %v782_v25 = vsel %vm583_vm2, 1, %v3289_v36  ;;  %vm1035_vm11 = vcmp.gt.s32.totalorder %v3526_v23, 2  ;;  %vm1036_vm12 = vcmp.gt.s32.totalorder %v3526_v23, 5  ;;  %vm1269_vm15 = vcmp.gt.s32.totalorder %v3526_v23, 3 }
  0x2b   : > { %2690 = vmatmul.mubr.msk.f32.gmra.mrb[4].mxu0 %vm421_vm1, %v399_v29  ;;  %3042 = vmatprep.subr.bf16.mxu0 %v3286_v11 }
  0x2c   : > { %528 = vmatprep.mubr.f32.mxu0 %v3287_v16  ;;  %3017 = vmatpush3.bf16.msra.mxu1 %v3448_v30 }
  0x2d   : > { %3018 = vmatprep.subr.bf16.mxu1 %v3286_v11 }
  0x2f   : > { %2691 = vmatmul.mubr.msk.f32.gmra.mrb[6].mxu0 %vm421_vm1, %v400_v31  ;;  %2846 = vmatmul.mubr.f32.vlgmr.msra.gmra.mrb[2].mxu1 %v3287_v16 }
  0x30   : > { %534 = vmatprep.mubr.f32.mxu0 %v3287_v16  ;;  %3020 = vmatpush3.bf16.msra.mxu1 %v3403_v17 }
  0x31   : > { %3021 = vmatprep.subr.bf16.mxu1 %v3286_v11  ;;  %2856 = vmatprep.mubr.msk.f32.mxu1 %vm3288_vm0, %v3287_v16 }
  0x33   : > { %2692 = vmatmul.mubr.msk.f32.gmra.mrb[8].mxu0 %vm421_vm1, %v401_v32 }
  0x34   : > { %540 = vmatprep.mubr.f32.mxu0 %v3287_v16  ;;  %3023 = vmatpush3.bf16.msra.mxu1 %v3418_v22 }
  0x35   : > { %3024 = vmatprep.subr.bf16.mxu1 %v3286_v11 }
  0x37   : > { %2693 = vmatmul.mubr.msk.f32.gmra.mrb[10].mxu0 %vm421_vm1, %v402_v33 }
  0x38   : > { %546 = vmatprep.mubr.f32.mxu0 %v3287_v16 }
  0x3b   : > { %2694 = vmatmul.mubr.msk.f32.gmra.mrb[12].mxu0 %vm421_vm1, %v403_v34 }
  0x3c   : > { %552 = vmatprep.mubr.f32.mxu0 %v3287_v16 }
  0x3f   : > { %2695 = vmatmul.mubr.msk.f32.gmra.mrb[14].mxu0 %vm421_vm1, %v404_v35  ;;  %vm1270_vm1 = vcmp.gt.s32.totalorder %v3526_v23, 4 }
  0x40   : > { %2878 = vmatprep.mubr.msk.f32.mxu0 %vm3288_vm0, %v3287_v16 }
  0xf6   : > { %v512_v44 = vpop.f32.mrb[0].mxu0 }
  0xf7   : > { %v513_v45 = vadd.f32 %v512_v44, %v414_v42  ;;  %v514_v46 = vpop.f32.mrb[1].mxu0 }
  0xf8   : > { %v3487_v47 = vadd.f32 %v514_v46, %v418_v43 }
  0xfa   : > { %v656_v48 = vpop.f32.mrb[0].mxu1  ;;  %v518_v49 = vpop.f32.mrb[2].mxu0 }
  0xfb   : > { %v660_v50 = vadd.f32 %v656_v48, %v513_v45  ;;  %v3489_v51 = vadd.f32 %v518_v49, %v414_v42  ;;  %v520_v52 = vpop.f32.mrb[3].mxu0  ;;  %v2836_v53 = vpop.f32.mrb[1].mxu1  ;;  %v793_v45 = vsel %vm584_vm3, 1, %v3289_v36 }
  0xfc   : > { %v3491_v54 = vadd.f32 %v520_v52, %v418_v43 }
  0xfd   : > { %3134 = vtanh.f32 %v660_v50  ;;  %v2696_v27 = vmul.f32 -1.442695, %v660_v50 }
  0xfe   : > { %v524_v55 = vpop.f32.mrb[4].mxu0 }
  0xff   : > { %v3493_v56 = vadd.f32 %v524_v55, %v414_v42  ;;  %v526_v57 = vpop.f32.mrb[5].mxu0 }
 0x100   : > { %v3495_v58 = vadd.f32 %v526_v57, %v418_v43 }
 0x102   : > { %v530_v59 = vpop.f32.mrb[6].mxu0  ;;  %v729_v60 = vpop.f32.mrb[2].mxu1 }
 0x103   : > { %v3497_v61 = vadd.f32 %v530_v59, %v414_v42  ;;  %v532_v62 = vpop.f32.mrb[7].mxu0  ;;  %v2847_v63 = vpop.f32.mrb[3].mxu1 }
 0x104   : > { %v3499_v0 = vadd.f32 %v532_v62, %v418_v43 }
 0x106   : > { %v536_v1 = vpop.f32.mrb[8].mxu0 }
 0x107   : > { %v3135_v2 = vpop.eup %3134  ;;  %v3501_v3 = vadd.f32 %v536_v1, %v414_v42  ;;  %v538_v4 = vpop.f32.mrb[9].mxu0 }
 0x108   : > { %v3503_v5 = vadd.f32 %v538_v4, %v418_v43  ;;  %743 = vrot.lane.b32.xlu0 %v3135_v2, %s3290_s17 }
 0x10a   : > { %v542_v6 = vpop.f32.mrb[10].mxu0 }
 0x10b   : > { %v3506_v7 = vadd.f32 %v542_v6, %v414_v42  ;;  %v544_v8 = vpop.f32.mrb[11].mxu0 }
 0x10c   : > { %v3508_v9 = vadd.f32 %v544_v8, %v418_v43 }
 0x10e   : > { %v548_v10 = vpop.f32.mrb[12].mxu0 }
 0x10f   : > { %v3510_v12 = vadd.f32 %v548_v10, %v414_v42  ;;  %v550_v13 = vpop.f32.mrb[13].mxu0 }
 0x110   : > { %v3512_v14 = vadd.f32 %v550_v13, %v418_v43 }
 0x112   : > { %v554_v15 = vpop.f32.mrb[14].mxu0 }
 0x113   : > { %v3515_v18 = vadd.f32 %v554_v15, %v414_v42  ;;  %v556_v19 = vpop.f32.mrb[15].mxu0 }
 0x114   : > { %v557_v20 = vadd.f32 %v556_v19, %v418_v43 }
 0x116   : > { %v733_v21 = vadd.f32 %v729_v60, %v557_v20 }
 0x118   : > { %3136 = vtanh.f32 %v733_v21  ;;  %v2697_v31 = vmul.f32 -1.442695, %v733_v21 }
 0x119   : > { %3138 = vpow2.f32 %v2696_v27 }
 0x122   : > { %v3137_v24 = vpop.eup %3136 }
 0x123   : > { %767 = vrot.lane.b32.xlu0 %v3137_v24, %s3290_s17  ;;  %v3139_v28 = vpop.eup %3138 }
 0x124   : > { %v737_v29 = vadd.f32 1.0, %v3139_v28 }
 0x126   : > { %3140 = vrcp.f32 %v737_v29 }
 0x127   : > { %784 = vperm.xlu0 %3132, %v782_v25   ;;  %3142 = vpow2.f32 %v2697_v31 }
 0x130   : > { %v3141_v32 = vpop.eup %3140 }
 0x131   : > { %v3143_v35 = vpop.eup %3142  ;;  %v741_v41 = vmul.f32 0.0, %v3141_v32 }
 0x132   : > { %v761_v37 = vadd.f32 1.0, %v3143_v35 }
 0x134   : > { %3144 = vrcp.f32 %v761_v37  ;;  %v1019_v37 = vsel %vm808_vm8, 1, %v3289_v36 }
 0x13e   : > { %v3145_v38 = vpop.eup %3144 }
 0x13f   : > { %v765_v46 = vmul.f32 0.0, %v3145_v38 }
 0x17a   : > { %v744_v33 = vpop.permute.xlu0 %743 }
 0x17b   : > { %v746_v34 = vmul.f32 %v3141_v32, %v744_v33 }
 0x17d   : > { %748 = vrot.lane.b32.xlu1 %v746_v34, %s3291_s23 }
 0x195   : > { %v768_v39 = vpop.permute.xlu0 %767 }
 0x196   : > { %v770_v40 = vmul.f32 %v3145_v38, %v768_v39 }
 0x198   : > { %772 = vrot.lane.b32.xlu1 %v770_v40, %s3291_s23 }
 0x1a6   : > { %v3543_v52 = vpop.permute.xlu0 %784 }
 0x1a7   : > { %vm786_vm4 = vcmp.eq.s32.totalorder %v3543_v52, 1 }
 0x1ef   : > { %v749_v42 = vpop.permute.xlu1 %748 }
 0x1f0   : > { %v3533_v43 = vadd.f32 %v749_v42, %v741_v41 }
 0x1f2   : > { %3146 = vtanh.f32 %v3533_v43 }
 0x1fc   : > { %v3147_v44 = vpop.eup %3146 }
 0x1fd   : > { %754 = vrot.lane.b32.xlu1 %v3147_v44, %s3290_s17 }
 0x201   : > { %795 = vperm.xlu1 %3133, %v793_v45  }
 0x20a   : > { %v773_v48 = vpop.permute.xlu1 %772 }
 0x20b   : > { %v3539_v49 = vadd.f32 %v773_v48, %v765_v46 }
 0x20d   : > { %3148 = vtanh.f32 %v3539_v49 }
 0x217   : > { %v3149_v50 = vpop.eup %3148 }
 0x218   : > { %778 = vrot.lane.b32.xlu0 %v3149_v50, %s3290_s17 }
 0x26f   : > { %v755_v53 = vpop.permute.xlu1 %754 }
 0x270   : > { %v757_v55 = vmul.f32 %v3141_v32, %v755_v53 }
 0x272   : > { %v3548_v57 = vsel %vm786_vm4, %v757_v55, 0.0 }
 0x273   : > { %789 = vrot.lane.b32.xlu1 %v3548_v57, %s3291_s23 }
 0x280   : > { %v3552_v59 = vpop.permute.xlu1 %795 }
 0x281   : > { %vm797_vm5 = vcmp.eq.s32.totalorder %v3552_v59, 1 }
 0x282   : > { %v3608_v44 = vsel %vm797_vm5, %v3539_v49, 0.0 }
 0x28a   : > { %v779_v60 = vpop.permute.xlu0 %778 }
 0x28b   : > { %v781_v62 = vmul.f32 %v3145_v38, %v779_v60  ;;  %v3598_v38 = vsel %vm786_vm4, %v3533_v43, 0.0 }
 0x28d   : > { %v3557_v63 = vsel %vm797_vm5, %v781_v62, 0.0 }
 0x28e   : > { %800 = vrot.lane.b32.xlu0 %v3557_v63, %s3291_s23 }
 0x2e5   : > { %v790_v1 = vpop.permute.xlu1 %789 }
 0x2e6   : > { %792 = vst.msk [vmem:[%s3562_s24] sm:$0xff] %vm586_vm6, %v790_v1  ;;  %2857 = vmatmul.mubr.msk.f32.vlgmr.msra.gmra.mrb[4].mxu1 %vm586_vm6, %v790_v1 }
 0x2e7   : > { %3026 = vmatpush3.bf16.msra.mxu1 %v3432_v26  ;;  %2867 = vmatprep.mubr.msk.f32.mxu1 %vm3288_vm0, %v3287_v16 }
 0x2e8   : > { %3027 = vmatprep.subr.bf16.mxu1 %v3286_v11 }
 0x2eb   : > { %3029 = vmatpush3.bf16.msra.mxu1 %v3448_v30 }
 0x2ec   : > { %3036 = vmatprep.subr.bf16.mxu1 %v3286_v11 }
 0x300   : > { %v801_v2 = vpop.permute.xlu0 %800 }
 0x301   : > { %2698 = vst.msk [vmem:[%s3574_s25 + $0x38] sm:$0xff] %vm586_vm6, %v801_v2  ;;  %2868 = vmatmul.mubr.msk.f32.vlgmr.msra.gmra.mrb[6].mxu1 %vm586_vm6, %v801_v2 }
 0x302   : > { %3038 = vmatpush3.bf16.msra.mxu1 %v3432_v26  ;;  %2889 = vmatprep.mubr.msk.f32.mxu1 %vm3288_vm0, %v3287_v16 }
 0x303   : > { %3039 = vmatprep.subr.bf16.mxu1 %v3286_v11 }
 0x306   : > { %3041 = vmatpush3.bf16.msra.mxu1 %v3448_v30 }
 0x307   : > { %3048 = vmatprep.subr.bf16.mxu1 %v3286_v11 }
 0x3b9   : > { %v879_v4 = vpop.f32.mrb[4].mxu1 }
 0x3ba   : > { %v883_v6 = vadd.f32 %v879_v4, %v3489_v51  ;;  %v2858_v8 = vpop.f32.mrb[5].mxu1 }
 0x3bc   : > { %3150 = vtanh.f32 %v883_v6  ;;  %v2701_v21 = vmul.f32 -1.442695, %v883_v6 }
 0x3c6   : > { %v3151_v10 = vpop.eup %3150 }
 0x3c7   : > { %968 = vrot.lane.b32.xlu1 %v3151_v10, %s3290_s17 }
 0x3d4   : > { %v954_v13 = vpop.f32.mrb[6].mxu1 }
 0x3d5   : > { %v958_v15 = vadd.f32 %v954_v13, %v3512_v14  ;;  %v2869_v19 = vpop.f32.mrb[7].mxu1  ;;  %v1007_v14 = vsel %vm807_vm7, 1, %v3289_v36 }
 0x3d7   : > { %3152 = vtanh.f32 %v958_v15  ;;  %v2702_v27 = vmul.f32 -1.442695, %v958_v15 }
 0x3d8   : > { %3154 = vpow2.f32 %v2701_v21 }
 0x3e1   : > { %v3153_v20 = vpop.eup %3152 }
 0x3e2   : > { %992 = vrot.lane.b32.xlu0 %v3153_v20, %s3290_s17  ;;  %v3155_v24 = vpop.eup %3154 }
 0x3e3   : > { %v962_v25 = vadd.f32 1.0, %v3155_v24 }
 0x3e5   : > { %3156 = vrcp.f32 %v962_v25 }
 0x3e6   : > { %3158 = vpow2.f32 %v2702_v27 }
 0x3ef   : > { %v3157_v51 = vpop.eup %3156 }
 0x3f0   : > { %v3159_v31 = vpop.eup %3158  ;;  %v966_v39 = vmul.f32 %v3157_v51, %v3598_v38 }
 0x3f1   : > { %v986_v32 = vadd.f32 1.0, %v3159_v31 }
 0x3f3   : > { %3160 = vrcp.f32 %v986_v32 }
 0x3fd   : > { %v3161_v33 = vpop.eup %3160 }
 0x3fe   : > { %v990_v45 = vmul.f32 %v3161_v33, %v3608_v44 }
 0x439   : > { %v969_v28 = vpop.permute.xlu1 %968 }
 0x43a   : > { %v971_v29 = vmul.f32 %v3157_v51, %v969_v28 }
 0x43c   : > { %973 = vrot.lane.b32.xlu1 %v971_v29, %s3291_s23 }
 0x440   : > { %1009 = vperm.xlu1 %3133, %v1007_v14  }
 0x454   : > { %v993_v34 = vpop.permute.xlu0 %992 }
 0x455   : > { %v995_v35 = vmul.f32 %v3161_v33, %v993_v34  ;;  %v1253_v34 = vsel %vm1036_vm12, 1, %v3289_v36 }
 0x457   : > { %997 = vrot.lane.b32.xlu0 %v995_v35, %s3291_s23 }
 0x45b   : > { %1021 = vperm.xlu0 %3132, %v1019_v37  }
 0x4ae   : > { %v974_v40 = vpop.permute.xlu1 %973 }
 0x4af   : > { %v3601_v41 = vadd.f32 %v974_v40, %v966_v39 }
 0x4b1   : > { %3162 = vtanh.f32 %v3601_v41 }
 0x4bb   : > { %v3163_v42 = vpop.eup %3162 }
 0x4bc   : > { %979 = vrot.lane.b32.xlu1 %v3163_v42, %s3290_s17 }
 0x4bf   : > { %v3615_v50 = vpop.permute.xlu1 %1009 }
 0x4c0   : > { %vm1011_vm9 = vcmp.eq.s32.totalorder %v3615_v50, 1 }
 0x4c1   : > { %v3669_v35 = vsel %vm1011_vm9, %v3601_v41, %v3598_v38 }
 0x4c9   : > { %v998_v46 = vpop.permute.xlu0 %997 }
 0x4ca   : > { %v3611_v43 = vadd.f32 %v998_v46, %v990_v45 }
 0x4cc   : > { %3164 = vtanh.f32 %v3611_v43 }
 0x4d6   : > { %v3165_v48 = vpop.eup %3164 }
 0x4d7   : > { %1003 = vrot.lane.b32.xlu0 %v3165_v48, %s3290_s17 }
 0x4da   : > { %v3628_v60 = vpop.permute.xlu0 %1021 }
 0x4db   : > { %vm1023_vm10 = vcmp.eq.s32.totalorder %v3628_v60, 1 }
 0x4dc   : > { %v3680_v45 = vsel %vm1023_vm10, %v3611_v43, %v3608_v44 }
 0x52e   : > { %v980_v53 = vpop.permute.xlu1 %979 }
 0x52f   : > { %v3617_v55 = vmul.f32 %v3157_v51, %v980_v53 }
 0x531   : > { %v3624_v49 = vsel %vm1011_vm9, %v3617_v55, %v3548_v57 }
 0x532   : > { %1040 = vrot.lane.b32.xlu1 %v3624_v49, %s3291_s23 }
 0x549   : > { %v1004_v62 = vpop.permute.xlu0 %1003 }
 0x54a   : > { %v3630_v1 = vmul.f32 %v3161_v33, %v1004_v62 }
 0x54c   : > { %v3637_v2 = vsel %vm1023_vm10, %v3630_v1, %v3557_v63 }
 0x54d   : > { %1118 = vrot.lane.b32.xlu0 %v3637_v2, %s3291_s23 }
 0x5a4   : > { %v1041_v57 = vpop.permute.xlu1 %1040 }
 0x5a5   : > { %2879 = vmatmul.mubr.msk.f32.vlgmr.msra.gmra.mrb[16].mxu0 %vm586_vm6, %v1041_v57 }
 0x5a6   : > { %3044 = vmatpush3.bf16.msra.mxu0 %v3403_v17  ;;  %2900 = vmatprep.mubr.msk.f32.mxu0 %vm3288_vm0, %v3287_v16 }
 0x5a7   : > { %3045 = vmatprep.subr.bf16.mxu0 %v3286_v11 }
 0x5aa   : > { %3047 = vmatpush3.bf16.msra.mxu0 %v3418_v22 }
 0x5ab   : > { %3054 = vmatprep.subr.bf16.mxu0 %v3286_v11 }
 0x5bf   : > { %v1119_v4 = vpop.permute.xlu0 %1118 }
 0x5c0   : > { %2890 = vmatmul.mubr.msk.f32.vlgmr.msra.gmra.mrb[8].mxu1 %vm586_vm6, %v1119_v4 }
 0x5c1   : > { %3050 = vmatpush3.bf16.msra.mxu1 %v3432_v26  ;;  %2911 = vmatprep.mubr.msk.f32.mxu1 %vm3288_vm0, %v3287_v16 }
 0x5c2   : > { %3051 = vmatprep.subr.bf16.mxu1 %v3286_v11 }
 0x5c5   : > { %3053 = vmatpush3.bf16.msra.mxu1 %v3448_v30 }
 0x5c6   : > { %3060 = vmatprep.subr.bf16.mxu1 %v3286_v11 }
 0x678   : > { %v1110_v63 = vpop.f32.mrb[16].mxu0 }
 0x679   : > { %v1114_v6 = vadd.f32 %v1110_v63, %v3493_v56  ;;  %v2880_v8 = vpop.f32.mrb[17].mxu0 }
 0x67b   : > { %3166 = vtanh.f32 %v1114_v6  ;;  %v2707_v21 = vmul.f32 -1.442695, %v1114_v6 }
 0x685   : > { %v3167_v10 = vpop.eup %3166 }
 0x686   : > { %1202 = vrot.lane.b32.xlu1 %v3167_v10, %s3290_s17 }
 0x693   : > { %v1188_v13 = vpop.f32.mrb[8].mxu1 }
 0x694   : > { %v1192_v15 = vadd.f32 %v1188_v13, %v3508_v9  ;;  %v2891_v19 = vpop.f32.mrb[9].mxu1  ;;  %v1241_v9 = vsel %vm1035_vm11, 1, %v3289_v36 }
 0x696   : > { %3168 = vtanh.f32 %v1192_v15  ;;  %v2708_v27 = vmul.f32 -1.442695, %v1192_v15 }
 0x697   : > { %3170 = vpow2.f32 %v2707_v21 }
 0x6a0   : > { %v3169_v20 = vpop.eup %3168 }
 0x6a1   : > { %1226 = vrot.lane.b32.xlu0 %v3169_v20, %s3290_s17  ;;  %v3171_v24 = vpop.eup %3170 }
 0x6a2   : > { %v1196_v25 = vadd.f32 1.0, %v3171_v24 }
 0x6a4   : > { %3172 = vrcp.f32 %v1196_v25 }
 0x6a5   : > { %3174 = vpow2.f32 %v2708_v27 }
 0x6ae   : > { %v3173_v56 = vpop.eup %3172 }
 0x6af   : > { %v3175_v29 = vpop.eup %3174  ;;  %v1200_v37 = vmul.f32 %v3173_v56, %v3669_v35 }
 0x6b0   : > { %v1220_v14 = vadd.f32 1.0, %v3175_v29 }
 0x6b2   : > { %3176 = vrcp.f32 %v1220_v14 }
 0x6bc   : > { %v3177_v31 = vpop.eup %3176 }
 0x6bd   : > { %v1224_v46 = vmul.f32 %v3177_v31, %v3680_v45 }
 0x6f8   : > { %v1203_v51 = vpop.permute.xlu1 %1202 }
 0x6f9   : > { %v1205_v28 = vmul.f32 %v3173_v56, %v1203_v51 }
 0x6fb   : > { %1207 = vrot.lane.b32.xlu1 %v1205_v28, %s3291_s23 }
 0x6ff   : > { %1243 = vperm.xlu1 %3133, %v1241_v9  }
 0x713   : > { %v1227_v32 = vpop.permute.xlu0 %1226 }
 0x714   : > { %v1229_v33 = vmul.f32 %v3177_v31, %v1227_v32 }
 0x716   : > { %1231 = vrot.lane.b32.xlu0 %v1229_v33, %s3291_s23 }
 0x71a   : > { %1255 = vperm.xlu0 %3132, %v1253_v34   ;;  %v1487_v34 = vsel %vm1270_vm1, 1, %v3289_v36 }
 0x76d   : > { %v1208_v39 = vpop.permute.xlu1 %1207 }
 0x76e   : > { %v3672_v40 = vadd.f32 %v1208_v39, %v1200_v37 }
 0x770   : > { %3178 = vtanh.f32 %v3672_v40 }
 0x77a   : > { %v3179_v42 = vpop.eup %3178 }
 0x77b   : > { %1213 = vrot.lane.b32.xlu1 %v3179_v42, %s3290_s17 }
 0x77e   : > { %v3687_v53 = vpop.permute.xlu1 %1243 }
 0x77f   : > { %vm1245_vm13 = vcmp.eq.s32.totalorder %v3687_v53, 1 }
 0x780   : > { %v3741_v37 = vsel %vm1245_vm13, %v3672_v40, %v3669_v35 }
 0x788   : > { %v1232_v38 = vpop.permute.xlu0 %1231 }
 0x789   : > { %v3683_v41 = vadd.f32 %v1232_v38, %v1224_v46 }
 0x78b   : > { %3180 = vtanh.f32 %v3683_v41 }
 0x795   : > { %v3181_v48 = vpop.eup %3180 }
 0x796   : > { %1237 = vrot.lane.b32.xlu0 %v3181_v48, %s3290_s17 }
 0x799   : > { %v3700_v43 = vpop.permute.xlu0 %1255 }
 0x79a   : > { %vm1257_vm14 = vcmp.eq.s32.totalorder %v3700_v43, 1 }
 0x7ed   : > { %v1214_v62 = vpop.permute.xlu1 %1213 }
 0x7ee   : > { %v3689_v57 = vmul.f32 %v3173_v56, %v1214_v62 }
 0x7f0   : > { %v3696_v44 = vsel %vm1245_vm13, %v3689_v57, %v3624_v49 }
 0x7f1   : > { %1274 = vrot.lane.b32.xlu1 %v3696_v44, %s3291_s23 }
 0x808   : > { %v1238_v4 = vpop.permute.xlu0 %1237 }
 0x809   : > { %v3702_v63 = vmul.f32 %v3177_v31, %v1238_v4 }
 0x80b   : > { %v3709_v6 = vsel %vm1257_vm14, %v3702_v63, %v3637_v2 }
 0x80c   : > { %1352 = vrot.lane.b32.xlu0 %v3709_v6, %s3291_s23 }
 0x863   : > { %v1275_v49 = vpop.permute.xlu1 %1274 }
 0x864   : > { %2901 = vmatmul.mubr.msk.f32.vlgmr.msra.gmra.mrb[18].mxu0 %vm586_vm6, %v1275_v49 }
 0x865   : > { %3056 = vmatpush3.bf16.msra.mxu0 %v3403_v17  ;;  %2922 = vmatprep.mubr.msk.f32.mxu0 %vm3288_vm0, %v3287_v16 }
 0x866   : > { %3057 = vmatprep.subr.bf16.mxu0 %v3286_v11 }
 0x869   : > { %3059 = vmatpush3.bf16.msra.mxu0 %v3418_v22 }
 0x86a   : > { %3066 = vmatprep.subr.bf16.mxu0 %v3286_v11 }
 0x87e   : > { %v1353_v8 = vpop.permute.xlu0 %1352 }
 0x87f   : > { %2912 = vmatmul.mubr.msk.f32.vlgmr.msra.gmra.mrb[10].mxu1 %vm586_vm6, %v1353_v8 }
 0x880   : > { %3062 = vmatpush3.bf16.msra.mxu1 %v3432_v26  ;;  %2933 = vmatprep.mubr.msk.f32.mxu1 %vm3288_vm0, %v3287_v16 }
 0x881   : > { %3063 = vmatprep.subr.bf16.mxu1 %v3286_v11 }
 0x884   : > { %3065 = vmatpush3.bf16.msra.mxu1 %v3448_v30 }
 0x885   : > { %3072 = vmatprep.subr.bf16.mxu1 %v3286_v11 }
 0x937   : > { %v1344_v2 = vpop.f32.mrb[18].mxu0 }
 0x938   : > { %v1348_v10 = vadd.f32 %v1344_v2, %v3497_v61  ;;  %v2902_v13 = vpop.f32.mrb[19].mxu0 }
 0x93a   : > { %3182 = vtanh.f32 %v1348_v10  ;;  %v2713_v25 = vmul.f32 -1.442695, %v1348_v10 }
 0x944   : > { %v3183_v15 = vpop.eup %3182 }
 0x945   : > { %1436 = vrot.lane.b32.xlu1 %v3183_v15, %s3290_s17 }
 0x952   : > { %v1422_v19 = vpop.f32.mrb[10].mxu1 }
 0x953   : > { %v1426_v20 = vadd.f32 %v1422_v19, %v3503_v5  ;;  %v2913_v21 = vpop.f32.mrb[11].mxu1  ;;  %v1475_v5 = vsel %vm1269_vm15, 1, %v3289_v36  ;;  %v3752_v36 = vsel %vm1257_vm14, %v3683_v41, %v3680_v45 }
 0x955   : > { %3184 = vtanh.f32 %v1426_v20  ;;  %v2714_v51 = vmul.f32 -1.442695, %v1426_v20 }
 0x956   : > { %3186 = vpow2.f32 %v2713_v25 }
 0x95f   : > { %v3185_v24 = vpop.eup %3184 }
 0x960   : > { %1460 = vrot.lane.b32.xlu0 %v3185_v24, %s3290_s17  ;;  %v3187_v27 = vpop.eup %3186 }
 0x961   : > { %v1430_v56 = vadd.f32 1.0, %v3187_v27 }
 0x963   : > { %3188 = vrcp.f32 %v1430_v56 }
 0x964   : > { %3190 = vpow2.f32 %v2714_v51 }
 0x96d   : > { %v3189_v61 = vpop.eup %3188 }
 0x96e   : > { %v3191_v29 = vpop.eup %3190  ;;  %v1434_v39 = vmul.f32 %v3189_v61, %v3741_v37 }
 0x96f   : > { %v1454_v14 = vadd.f32 1.0, %v3191_v29 }
 0x971   : > { %3192 = vrcp.f32 %v1454_v14 }
 0x97b   : > { %v3193_v31 = vpop.eup %3192 }
 0x97c   : > { %v1458_v23 = vmul.f32 %v3193_v31, %v3752_v36 }
 0x9b7   : > { %v1437_v28 = vpop.permute.xlu1 %1436 }
 0x9b8   : > { %v1439_v9 = vmul.f32 %v3189_v61, %v1437_v28 }
 0x9ba   : > { %1441 = vrot.lane.b32.xlu1 %v1439_v9, %s3291_s23 }
 0x9be   : > { %1477 = vperm.xlu1 %3133, %v1475_v5  }
 0x9d2   : > { %v1461_v32 = vpop.permute.xlu0 %1460 }
 0x9d3   : > { %v1463_v33 = vmul.f32 %v3193_v31, %v1461_v32 }
 0x9d5   : > { %1465 = vrot.lane.b32.xlu0 %v1463_v33, %s3291_s23 }
 0x9d9   : > { %1489 = vperm.xlu0 %3132, %v1487_v34  }
 0xa2c   : > { %v1442_v42 = vpop.permute.xlu1 %1441 }
 0xa2d   : > { %v3744_v46 = vadd.f32 %v1442_v42, %v1434_v39 }
 0xa2f   : > { %3194 = vtanh.f32 %v3744_v46 }
 0xa39   : > { %v3195_v38 = vpop.eup %3194 }
 0xa3a   : > { %1447 = vrot.lane.b32.xlu1 %v3195_v38, %s3290_s17 }
 0xa3d   : > { %v3759_v62 = vpop.permute.xlu1 %1477 }
 0xa3e   : > { %vm1479_vm2 = vcmp.eq.s32.totalorder %v3759_v62, 1 }
 0xa3f   : > { %v3809_v33 = vsel %vm1479_vm2, %v3744_v46, %v3741_v37 }
 0xa47   : > { %v1466_v35 = vpop.permute.xlu0 %1465 }
 0xa48   : > { %v3755_v40 = vadd.f32 %v1466_v35, %v1458_v23 }
 0xa4a   : > { %3196 = vtanh.f32 %v3755_v40 }
 0xa54   : > { %v3197_v48 = vpop.eup %3196 }
 0xa55   : > { %1471 = vrot.lane.b32.xlu0 %v3197_v48, %s3290_s17 }
 0xa58   : > { %v3772_v41 = vpop.permute.xlu0 %1489 }
 0xa59   : > { %vm1491_vm3 = vcmp.eq.s32.totalorder %v3772_v41, 1 }
 0xa5a   : > { %v3820_v23 = vsel %vm1491_vm3, %v3755_v40, %v3752_v36 }
 0xaac   : > { %v1448_v4 = vpop.permute.xlu1 %1447 }
 0xaad   : > { %v3761_v49 = vmul.f32 %v3189_v61, %v1448_v4 }
 0xaaf   : > { %v3768_v45 = vsel %vm1479_vm2, %v3761_v49, %v3696_v44 }
 0xab0   : > { %1506 = vrot.lane.b32.xlu1 %v3768_v45, %s3291_s23 }
 0xac7   : > { %v1472_v8 = vpop.permute.xlu0 %1471 }
 0xac8   : > { %v3774_v2 = vmul.f32 %v3193_v31, %v1472_v8 }
 0xaca   : > { %v3781_v10 = vsel %vm1491_vm3, %v3774_v2, %v3709_v6 }
 0xacb   : > { %1584 = vrot.lane.b32.xlu0 %v3781_v10, %s3291_s23 }
 0xb22   : > { %v1507_v44 = vpop.permute.xlu1 %1506 }
 0xb23   : > { %2923 = vmatmul.mubr.msk.f32.vlgmr.msra.gmra.mrb[20].mxu0 %vm586_vm6, %v1507_v44 }
 0xb24   : > { %3068 = vmatpush3.bf16.msra.mxu0 %v3403_v17  ;;  %2944 = vmatprep.mubr.msk.f32.mxu0 %vm3288_vm0, %v3287_v16 }
 0xb25   : > { %3069 = vmatprep.subr.bf16.mxu0 %v3286_v11 }
 0xb28   : > { %3071 = vmatpush3.bf16.msra.mxu0 %v3418_v22 }
 0xb29   : > { %3078 = vmatprep.subr.bf16.mxu0 %v3286_v11 }
 0xb3d   : > { %v1585_v13 = vpop.permute.xlu0 %1584 }
 0xb3e   : > { %2934 = vmatmul.mubr.msk.f32.vlgmr.msra.gmra.mrb[12].mxu1 %vm586_vm6, %v1585_v13 }
 0xb3f   : > { %3074 = vmatpush3.bf16.msra.mxu1 %v3432_v26  ;;  %2955 = vmatprep.mubr.msk.f32.mxu1 %vm3288_vm0, %v3287_v16 }
 0xb40   : > { %3075 = vmatprep.subr.bf16.mxu1 %v3286_v11 }
 0xb43   : > { %3077 = vmatpush3.bf16.msra.mxu1 %v3448_v30 }
 0xb44   : > { %3084 = vmatprep.subr.bf16.mxu1 %v3286_v11 }
 0xbf6   : > { %v1576_v6 = vpop.f32.mrb[20].mxu0 }
 0xbf7   : > { %v1580_v15 = vadd.f32 %v1576_v6, %v3501_v3  ;;  %v2924_v19 = vpop.f32.mrb[21].mxu0 }
 0xbf9   : > { %3198 = vtanh.f32 %v1580_v15  ;;  %v2719_v56 = vmul.f32 -1.442695, %v1580_v15 }
 0xc03   : > { %v3199_v20 = vpop.eup %3198 }
 0xc04   : > { %1668 = vrot.lane.b32.xlu1 %v3199_v20, %s3290_s17 }
 0xc11   : > { %v1654_v21 = vpop.f32.mrb[12].mxu1 }
 0xc12   : > { %v1658_v24 = vadd.f32 %v1654_v21, %v3499_v0  ;;  %v2935_v25 = vpop.f32.mrb[13].mxu1 }
 0xc14   : > { %3200 = vtanh.f32 %v1658_v24  ;;  %v2720_v28 = vmul.f32 -1.442695, %v1658_v24 }
 0xc15   : > { %3202 = vpow2.f32 %v2719_v56 }
 0xc1e   : > { %v3201_v27 = vpop.eup %3200 }
 0xc1f   : > { %1692 = vrot.lane.b32.xlu0 %v3201_v27, %s3290_s17  ;;  %v3203_v51 = vpop.eup %3202 }
 0xc20   : > { %v1662_v61 = vadd.f32 1.0, %v3203_v51 }
 0xc22   : > { %3204 = vrcp.f32 %v1662_v61 }
 0xc23   : > { %3206 = vpow2.f32 %v2720_v28 }
 0xc2c   : > { %v3205_v3 = vpop.eup %3204 }
 0xc2d   : > { %v3207_v29 = vpop.eup %3206  ;;  %v1666_v34 = vmul.f32 %v3205_v3, %v3809_v33 }
 0xc2e   : > { %v1686_v14 = vadd.f32 1.0, %v3207_v29 }
 0xc30   : > { %3208 = vrcp.f32 %v1686_v14 }
 0xc3a   : > { %v3209_v0 = vpop.eup %3208 }
 0xc3b   : > { %v1690_v35 = vmul.f32 %v3209_v0, %v3820_v23 }
 0xc76   : > { %v1669_v9 = vpop.permute.xlu1 %1668 }
 0xc77   : > { %v1671_v5 = vmul.f32 %v3205_v3, %v1669_v9 }
 0xc79   : > { %1673 = vrot.lane.b32.xlu1 %v1671_v5, %s3291_s23 }
 0xc91   : > { %v1693_v31 = vpop.permute.xlu0 %1692 }
 0xc92   : > { %v1695_v32 = vmul.f32 %v3209_v0, %v1693_v31 }
 0xc94   : > { %1697 = vrot.lane.b32.xlu0 %v1695_v32, %s3291_s23 }
 0xceb   : > { %v1674_v39 = vpop.permute.xlu1 %1673 }
 0xcec   : > { %v3812_v42 = vadd.f32 %v1674_v39, %v1666_v34 }
 0xcee   : > { %3210 = vtanh.f32 %v3812_v42  ;;  %v3871_v31 = vsel %vm1491_vm3, %v3812_v42, %v3809_v33 }
 0xcf8   : > { %v3211_v38 = vpop.eup %3210 }
 0xcf9   : > { %1679 = vrot.lane.b32.xlu1 %v3211_v38, %s3290_s17 }
 0xd06   : > { %v1698_v37 = vpop.permute.xlu0 %1697 }
 0xd07   : > { %v3823_v46 = vadd.f32 %v1698_v37, %v1690_v35 }
 0xd09   : > { %3212 = vtanh.f32 %v3823_v46  ;;  %v3879_v35 = vsel %vm1479_vm2, %v3823_v46, %v3820_v23 }
 0xd13   : > { %v3213_v48 = vpop.eup %3212 }
 0xd14   : > { %1703 = vrot.lane.b32.xlu0 %v3213_v48, %s3290_s17 }
 0xd6b   : > { %v1680_v4 = vpop.permute.xlu1 %1679 }
 0xd6c   : > { %v3827_v8 = vmul.f32 %v3205_v3, %v1680_v4 }
 0xd6e   : > { %v3833_v44 = vsel %vm1491_vm3, %v3827_v8, %v3768_v45 }
 0xd6f   : > { %1728 = vrot.lane.b32.xlu1 %v3833_v44, %s3291_s23 }
 0xd86   : > { %v1704_v36 = vpop.permute.xlu0 %1703 }
 0xd87   : > { %v3837_v40 = vmul.f32 %v3209_v0, %v1704_v36 }
 0xd89   : > { %v3843_v13 = vsel %vm1479_vm2, %v3837_v40, %v3781_v10  ;;  %v1714_v60 = vsel %vm1479_vm2, %v3837_v40, 0.0 }
 0xd8a   : > { %1806 = vrot.lane.b32.xlu0 %v3843_v13, %s3291_s23 }
 0xde1   : > { %v1729_v6 = vpop.permute.xlu1 %1728 }
 0xde2   : > { %2945 = vmatmul.mubr.msk.f32.vlgmr.msra.gmra.mrb[22].mxu0 %vm586_vm6, %v1729_v6 }
 0xde3   : > { %3080 = vmatpush3.bf16.msra.mxu0 %v3403_v17  ;;  %2966 = vmatprep.mubr.msk.f32.mxu0 %vm3288_vm0, %v3287_v16 }
 0xde4   : > { %3081 = vmatprep.subr.bf16.mxu0 %v3286_v11 }
 0xde7   : > { %3083 = vmatpush3.bf16.msra.mxu0 %v3418_v22 }
 0xde8   : > { %3090 = vmatprep.subr.bf16.mxu0 %v3286_v11 }
 0xdfc   : > { %v1807_v45 = vpop.permute.xlu0 %1806 }
 0xdfd   : > { %2956 = vmatmul.mubr.msk.f32.vlgmr.msra.gmra.mrb[14].mxu1 %vm586_vm6, %v1807_v45 }
 0xdfe   : > { %3086 = vmatpush3.bf16.msra.mxu1 %v3432_v26  ;;  %2977 = vmatprep.mubr.msk.f32.mxu1 %vm3288_vm0, %v3287_v16 }
 0xdff   : > { %3087 = vmatprep.subr.bf16.mxu1 %v3286_v11 }
 0xe02   : > { %3089 = vmatpush3.bf16.msra.mxu1 %v3448_v30 }
 0xe03   : > { %3096 = vmatprep.subr.bf16.mxu1 %v3286_v11 }
 0xeb5   : > { %v1798_v10 = vpop.f32.mrb[22].mxu0 }
 0xeb6   : > { %v1802_v15 = vadd.f32 %v1798_v10, %v3506_v7  ;;  %v2946_v19 = vpop.f32.mrb[23].mxu0 }
 0xeb8   : > { %3214 = vtanh.f32 %v1802_v15  ;;  %v2725_v56 = vmul.f32 -1.442695, %v1802_v15 }
 0xec2   : > { %v3215_v20 = vpop.eup %3214 }
 0xec3   : > { %1890 = vrot.lane.b32.xlu1 %v3215_v20, %s3290_s17 }
 0xed0   : > { %v1876_v21 = vpop.f32.mrb[14].mxu1 }
 0xed1   : > { %v1880_v24 = vadd.f32 %v1876_v21, %v3495_v58  ;;  %v2957_v25 = vpop.f32.mrb[15].mxu1 }
 0xed3   : > { %3216 = vtanh.f32 %v1880_v24  ;;  %v2726_v28 = vmul.f32 -1.442695, %v1880_v24 }
 0xed4   : > { %3218 = vpow2.f32 %v2725_v56 }
 0xedd   : > { %v3217_v27 = vpop.eup %3216 }
 0xede   : > { %1914 = vrot.lane.b32.xlu0 %v3217_v27, %s3290_s17  ;;  %v3219_v51 = vpop.eup %3218 }
 0xedf   : > { %v1884_v61 = vadd.f32 1.0, %v3219_v51 }
 0xee1   : > { %3220 = vrcp.f32 %v1884_v61 }
 0xee2   : > { %3222 = vpow2.f32 %v2726_v28 }
 0xeeb   : > { %v3221_v7 = vpop.eup %3220 }
 0xeec   : > { %v3223_v5 = vpop.eup %3222  ;;  %v1888_v32 = vmul.f32 %v3221_v7, %v3871_v31 }
 0xeed   : > { %v1908_v29 = vadd.f32 1.0, %v3223_v5 }
 0xeef   : > { %3224 = vrcp.f32 %v1908_v29 }
 0xef9   : > { %v3225_v58 = vpop.eup %3224 }
 0xefa   : > { %v1912_v37 = vmul.f32 %v3225_v58, %v3879_v35 }
 0xf35   : > { %v1891_v3 = vpop.permute.xlu1 %1890 }
 0xf36   : > { %v1893_v9 = vmul.f32 %v3221_v7, %v1891_v3 }
 0xf38   : > { %1895 = vrot.lane.b32.xlu1 %v1893_v9, %s3291_s23 }
 0xf50   : > { %v1915_v14 = vpop.permute.xlu0 %1914 }
 0xf51   : > { %v1917_v0 = vmul.f32 %v3225_v58, %v1915_v14 }
 0xf53   : > { %1919 = vrot.lane.b32.xlu0 %v1917_v0, %s3291_s23 }
 0xfaa   : > { %v1896_v34 = vpop.permute.xlu1 %1895 }
 0xfab   : > { %v1898_v39 = vadd.f32 %v1896_v34, %v1888_v32 }
 0xfad   : > { %3226 = vtanh.f32 %v1898_v39 }
 0xfb7   : > { %v3227_v38 = vpop.eup %3226 }
 0xfb8   : > { %1901 = vrot.lane.b32.xlu1 %v3227_v38, %s3290_s17 }
 0xfc5   : > { %v1920_v48 = vpop.permute.xlu0 %1919 }
 0xfc6   : > { %v1922_v4 = vadd.f32 %v1920_v48, %v1912_v37 }
 0xfc8   : > { %3228 = vtanh.f32 %v1922_v4 }
 0xfd2   : > { %v3229_v33 = vpop.eup %3228 }
 0xfd3   : > { %1925 = vrot.lane.b32.xlu0 %v3229_v33, %s3290_s17 }
0x102a   : > { %v1902_v42 = vpop.permute.xlu1 %1901 }
0x102b   : > { %v3883_v36 = vmul.f32 %v3221_v7, %v1902_v42  ;;  %v1944_v7 = vsel %vm1257_vm14, %v1898_v39, %v3871_v31 }
0x102d   : > { %v3889_v6 = vsel %vm1257_vm14, %v3883_v36, %v3833_v44 }
0x102e   : > { %1950 = vrot.lane.b32.xlu1 %v3889_v6, %s3291_s23 }
0x1045   : > { %v1926_v23 = vpop.permute.xlu0 %1925 }
0x1046   : > { %v3893_v46 = vmul.f32 %v3225_v58, %v1926_v23  ;;  %v1946_v58 = vsel %vm1245_vm13, %v1922_v4, %v3879_v35 }
0x1048   : > { %v3899_v45 = vsel %vm1245_vm13, %v3893_v46, %v3843_v13 }
0x1049   : > { %2028 = vrot.lane.b32.xlu0 %v3899_v45, %s3291_s23 }
0x10a0   : > { %v1951_v10 = vpop.permute.xlu1 %1950 }
0x10a1   : > { %2967 = vmatmul.mubr.msk.f32.vlgmr.msra.gmra.mrb[24].mxu0 %vm586_vm6, %v1951_v10 }
0x10a2   : > { %3092 = vmatpush3.bf16.msra.mxu0 %v3403_v17  ;;  %2988 = vmatprep.mubr.msk.f32.mxu0 %vm3288_vm0, %v3287_v16 }
0x10a3   : > { %3093 = vmatprep.subr.bf16.mxu0 %v3286_v11 }
0x10a6   : > { %3095 = vmatpush3.bf16.msra.mxu0 %v3418_v22 }
0x10bb   : > { %v2029_v44 = vpop.permute.xlu0 %2028 }
0x10bc   : > { %2978 = vmatmul.mubr.msk.f32.vlgmr.msra.gmra.mrb[16].mxu1 %vm586_vm6, %v2029_v44 }
0x10bd   : > { %3098 = vmatpush3.bf16.msra.mxu1 %v3432_v26  ;;  %2999 = vmatprep.mubr.msk.f32.mxu1 %vm3288_vm0, %v3287_v16  ;;  %vm2406_vm0 = vcmask 523264  }
0x10be   : > { %3099 = vmatprep.subr.bf16.mxu1 %v3286_v11 }
0x10c1   : > { %3101 = vmatpush3.bf16.msra.mxu1 %v3448_v30 }
0x1174   : > { %v2020_v17 = vpop.f32.mrb[24].mxu0 }
0x1175   : > { %v2024_v13 = vadd.f32 %v2020_v17, %v3510_v12  ;;  %v2968_v15 = vpop.f32.mrb[25].mxu0 }
0x1177   : > { %3230 = vtanh.f32 %v2024_v13  ;;  %v2731_v16 = vmul.f32 -1.442695, %v2024_v13 }
0x1181   : > { %v3231_v19 = vpop.eup %3230 }
0x1182   : > { %2112 = vrot.lane.b32.xlu1 %v3231_v19, %s3290_s17 }
0x118f   : > { %v2098_v22 = vpop.f32.mrb[16].mxu1 }
0x1190   : > { %v2102_v20 = vadd.f32 %v2098_v22, %v3491_v54  ;;  %v2979_v21 = vpop.f32.mrb[17].mxu1 }
0x1192   : > { %3232 = vtanh.f32 %v2102_v20  ;;  %v2732_v24 = vmul.f32 -1.442695, %v2102_v20 }
0x1193   : > { %3234 = vpow2.f32 %v2731_v16 }
0x119c   : > { %v3233_v26 = vpop.eup %3232 }
0x119d   : > { %2136 = vrot.lane.b32.xlu0 %v3233_v26, %s3290_s17  ;;  %v3235_v11 = vpop.eup %3234 }
0x119e   : > { %v2106_v30 = vadd.f32 1.0, %v3235_v11 }
0x11a0   : > { %3236 = vrcp.f32 %v2106_v30 }
0x11a1   : > { %3238 = vpow2.f32 %v2732_v24 }
0x11aa   : > { %v3237_v12 = vpop.eup %3236 }
0x11ab   : > { %v3239_v56 = vpop.eup %3238  ;;  %v2110_v3 = vmul.f32 %v3237_v12, %v1944_v7 }
0x11ac   : > { %v2130_v51 = vadd.f32 1.0, %v3239_v56 }
0x11ae   : > { %3240 = vrcp.f32 %v2130_v51 }
0x11b8   : > { %v3241_v54 = vpop.eup %3240 }
0x11b9   : > { %v2134_v14 = vmul.f32 %v3241_v54, %v1946_v58 }
0x11f4   : > { %v2113_v25 = vpop.permute.xlu1 %2112 }
0x11f5   : > { %v2115_v27 = vmul.f32 %v3237_v12, %v2113_v25 }
0x11f7   : > { %2117 = vrot.lane.b32.xlu1 %v2115_v27, %s3291_s23 }
0x120f   : > { %v2137_v61 = vpop.permute.xlu0 %2136 }
0x1210   : > { %v2139_v28 = vmul.f32 %v3241_v54, %v2137_v61  ;;  %v1012_v61 = vsel %vm1011_vm9, %v3617_v55, 0.0  ;;  %v1707_v55 = vsel %vm1491_vm3, %v3827_v8, 0.0 }
0x1212   : > { %2141 = vrot.lane.b32.xlu0 %v2139_v28, %s3291_s23  ;;  %v1246_v28 = vsel %vm1245_vm13, %v3689_v57, 0.0  ;;  %v1929_v57 = vsel %vm1257_vm14, %v3883_v36, 0.0  ;;  %v1024_v36 = vsel %vm1023_vm10, %v3630_v1, 0.0  ;;  %v1936_v1 = vsel %vm1245_vm13, %v3893_v46, 0.0 }
0x1269   : > { %v2118_v9 = vpop.permute.xlu1 %2117 }
0x126a   : > { %v2120_v5 = vadd.f32 %v2118_v9, %v2110_v3 }
0x126c   : > { %3242 = vtanh.f32 %v2120_v5 }
0x1276   : > { %v3243_v29 = vpop.eup %3242 }
0x1277   : > { %2123 = vrot.lane.b32.xlu1 %v3243_v29, %s3290_s17  ;;  %v1480_v29 = vsel %vm1479_vm2, %v3761_v49, 0.0 }
0x1284   : > { %v2142_v0 = vpop.permute.xlu0 %2141 }
0x1285   : > { %v2144_v32 = vadd.f32 %v2142_v0, %v2134_v14  ;;  %v1258_v14 = vsel %vm1257_vm14, %v3702_v63, 0.0  ;;  %v1492_v0 = vsel %vm1491_vm3, %v3774_v2, 0.0 }
0x1287   : > { %3244 = vtanh.f32 %v2144_v32 }
0x1291   : > { %v3245_v34 = vpop.eup %3244 }
0x1292   : > { %2147 = vrot.lane.b32.xlu0 %v3245_v34, %s3290_s17 }
0x12e9   : > { %v2124_v38 = vpop.permute.xlu1 %2123 }
0x12ea   : > { %v3929_v31 = vmul.f32 %v3237_v12, %v2124_v38  ;;  %v2166_v12 = vsel %vm1023_vm10, %v2120_v5, %v1944_v7  ;;  %v2168_v7 = vsel %vm1011_vm9, %v2144_v32, %v1946_v58 }
0x12ec   : > { %v3935_v39 = vsel %vm1023_vm10, %v3929_v31, %v3889_v6  ;;  %v2151_v49 = vsel %vm1023_vm10, %v3929_v31, 0.0 }
0x12ed   : > { %2172 = vrot.lane.b32.xlu1 %v3935_v39, %s3291_s23 }
0x1304   : > { %v2148_v35 = vpop.permute.xlu0 %2147 }
0x1305   : > { %v3939_v37 = vmul.f32 %v3241_v54, %v2148_v35 }
0x1307   : > { %v3945_v48 = vsel %vm1011_vm9, %v3939_v37, %v3899_v45  ;;  %v2158_v43 = vsel %vm1011_vm9, %v3939_v37, 0.0 }
0x1308   : > { %2249 = vrot.lane.b32.xlu0 %v3945_v48, %s3291_s23 }
0x135f   : > { %v2173_v4 = vpop.permute.xlu1 %2172 }
0x1360   : > { %2989 = vmatmul.mubr.msk.f32.vlgmr.msra.gmra.mrb[26].mxu0 %vm586_vm6, %v2173_v4 }
0x137a   : > { %v2250_v33 = vpop.permute.xlu0 %2249 }
0x137b   : > { %3000 = vmatmul.mubr.msk.f32.vlgmr.msra.gmra.mrb[18].mxu1 %vm586_vm6, %v2250_v33 }
0x1433   : > { %v2242_v42 = vpop.f32.mrb[26].mxu0 }
0x1434   : > { %v2246_v6 = vadd.f32 %v2242_v42, %v3515_v18  ;;  %v2990_v23 = vpop.f32.mrb[27].mxu0 }
0x1436   : > { %3246 = vtanh.f32 %v2246_v6  ;;  %v2737_v15 = vmul.f32 -1.442695, %v2246_v6 }
0x1440   : > { %v3247_v10 = vpop.eup %3246 }
0x1441   : > { %2333 = vrot.lane.b32.xlu1 %v3247_v10, %s3290_s17 }
0x144e   : > { %v2319_v44 = vpop.f32.mrb[18].mxu1 }
0x144f   : > { %v2323_v45 = vadd.f32 %v2319_v44, %v3487_v47  ;;  %v3001_v17 = vpop.f32.mrb[19].mxu1 }
0x1451   : > { %3248 = vtanh.f32 %v2323_v45  ;;  %v2738_v20 = vmul.f32 -1.442695, %v2323_v45 }
0x1452   : > { %3250 = vpow2.f32 %v2737_v15 }
0x145b   : > { %v3249_v13 = vpop.eup %3248 }
0x145c   : > { %2357 = vrot.lane.b32.xlu0 %v3249_v13, %s3290_s17  ;;  %v3251_v19 = vpop.eup %3250 }
0x145d   : > { %v2327_v22 = vadd.f32 1.0, %v3251_v19  ;;  %v2469_v19 = vld [vmem:[%s3562_s24] sm:$0xff] (%p3368_p5) }
0x145e   : > { %2470 = vst [vmem:[%s2427_s15] sm:$0xff] (%p3368_p5), %v2469_v19 }
0x145f   : > { %3252 = vrcp.f32 %v2327_v22 }
0x1460   : > { %3254 = vpow2.f32 %v2738_v20 }
0x1469   : > { %v3253_v18 = vpop.eup %3252 }
0x146a   : > { %v3255_v16 = vpop.eup %3254  ;;  %v2331_v25 = vmul.f32 %v3253_v18, %v2166_v12 }
0x146b   : > { %v2351_v11 = vadd.f32 1.0, %v3255_v16 }
0x146d   : > { %3256 = vrcp.f32 %v2351_v11 }
0x1477   : > { %v3956_v47 = vpop.eup %3256 }
0x1478   : > { %v2355_v3 = vmul.f32 %v3956_v47, %v2168_v7 }
0x14b3   : > { %v2334_v21 = vpop.permute.xlu1 %2333 }
0x14b4   : > { %v2336_v26 = vmul.f32 %v3253_v18, %v2334_v21 }
0x14b6   : > { %2338 = vrot.lane.b32.xlu1 %v2336_v26, %s3291_s23 }
0x14ce   : > { %v2358_v30 = vpop.permute.xlu0 %2357 }
0x14cf   : > { %v2360_v24 = vmul.f32 %v3956_v47, %v2358_v30 }
0x14d1   : > { %2362 = vrot.lane.b32.xlu0 %v2360_v24, %s3291_s23 }
0x1528   : > { %v2339_v27 = vpop.permute.xlu1 %2338 }
0x1529   : > { %v2341_v56 = vadd.f32 %v2339_v27, %v2331_v25 }
0x152b   : > { %3258 = vtanh.f32 %v2341_v56  ;;  %v2386_v54 = vsel %vm797_vm5, %v2341_v56, %v2166_v12 }
0x1535   : > { %v3259_v51 = vpop.eup %3258 }
0x1536   : > { %2344 = vrot.lane.b32.xlu1 %v3259_v51, %s3290_s17 }
0x153a   : > { %2398 = vrot.lane.b32.xlu1 %v2386_v54, %s3291_s23 }
0x153e   : > { %1014 = vrot.lane.b32.xlu1 %v1012_v61, %s3291_s23 }
0x1542   : > { %1248 = vrot.lane.b32.xlu1 %v1246_v28, %s3291_s23 }
0x1543   : > { %v2363_v9 = vpop.permute.xlu0 %2362 }
0x1544   : > { %v2365_v5 = vadd.f32 %v2363_v9, %v2355_v3 }
0x1546   : > { %3260 = vtanh.f32 %v2365_v5  ;;  %1482 = vrot.lane.b32.xlu1 %v1480_v29, %s3291_s23  ;;  %v2388_v8 = vsel %vm786_vm4, %v2365_v5, %v2168_v7 }
0x154a   : > { %1709 = vrot.lane.b32.xlu1 %v1707_v55, %s3291_s23 }
0x154e   : > { %1931 = vrot.lane.b32.xlu1 %v1929_v57, %s3291_s23 }
0x1550   : > { %v3261_v58 = vpop.eup %3260 }
0x1551   : > { %2368 = vrot.lane.b32.xlu0 %v3261_v58, %s3290_s17 }
0x1552   : > { %2153 = vrot.lane.b32.xlu1 %v2151_v49, %s3291_s23 }
0x1555   : > { %2402 = vrot.lane.b32.xlu0 %v2388_v8, %s3290_s17 }
0x1559   : > { %1026 = vrot.lane.b32.xlu0 %v1024_v36, %s3291_s23 }
0x155d   : > { %1260 = vrot.lane.b32.xlu0 %v1258_v14, %s3291_s23 }
0x1561   : > { %1494 = vrot.lane.b32.xlu0 %v1492_v0, %s3291_s23 }
0x1565   : > { %1716 = vrot.lane.b32.xlu0 %v1714_v60, %s3291_s23 }
0x1569   : > { %1938 = vrot.lane.b32.xlu0 %v1936_v1, %s3291_s23 }
0x156d   : > { %2160 = vrot.lane.b32.xlu0 %v2158_v43, %s3291_s23 }
0x15a8   : > { %v2345_v63 = vpop.permute.xlu1 %2344 }
0x15a9   : > { %v2347_v62 = vmul.f32 %v3253_v18, %v2345_v63 }
0x15ab   : > { %v2385_v41 = vsel %vm797_vm5, %v2347_v62, %v3935_v39  ;;  %v2372_v53 = vsel %vm797_vm5, %v2347_v62, 0.0 }
0x15ac   : > { %v2399_v2 = vpop.permute.xlu1 %2398  ;;  %2390 = vrot.lane.b32.xlu1 %v2385_v41, %s3291_s23 }
0x15b0   : > { %v1015_v40 = vpop.permute.xlu1 %1014  ;;  %2374 = vrot.lane.b32.xlu1 %v2372_v53, %s3291_s23 }
0x15b1   : > { %2703 = vst.msk [vmem:[%s3562_s24 + $0x8] sm:$0xff] %vm586_vm6, %v1015_v40 }
0x15b4   : > { %v1249_v50 = vpop.permute.xlu1 %1248 }
0x15b5   : > { %2709 = vst.msk [vmem:[%s3562_s24 + $0x10] sm:$0xff] %vm586_vm6, %v1249_v50 }
0x15b8   : > { %v1483_v46 = vpop.permute.xlu1 %1482  ;;  %v2471_v22 = vld [vmem:[%s3562_s24 + $0x8] sm:$0xff] (%p3368_p5) }
0x15b9   : > { %2715 = vst.msk [vmem:[%s3562_s24 + $0x18] sm:$0xff] %vm586_vm6, %v1483_v46  ;;  %2472 = vst [vmem:[%s2427_s15 + $0x10] sm:$0xff] (%p3368_p5), %v2471_v22 }
0x15bc   : > { %v1710_v32 = vpop.permute.xlu1 %1709  ;;  %v2473_v20 = vld [vmem:[%s3562_s24 + $0x10] sm:$0xff] (%p3368_p5) }
0x15bd   : > { %2721 = vst.msk [vmem:[%s3562_s24 + $0x20] sm:$0xff] %vm586_vm6, %v1710_v32  ;;  %2474 = vst [vmem:[%s2427_s15 + $0x20] sm:$0xff] (%p3368_p5), %v2473_v20 }
0x15c0   : > { %v1932_v34 = vpop.permute.xlu1 %1931  ;;  %v2475_v18 = vld [vmem:[%s3562_s24 + $0x18] sm:$0xff] (%p3368_p5) }
0x15c1   : > { %2727 = vst.msk [vmem:[%s3562_s24 + $0x28] sm:$0xff] %vm586_vm6, %v1932_v34  ;;  %2476 = vst [vmem:[%s2427_s15 + $0x30] sm:$0xff] (%p3368_p5), %v2475_v18 }
0x15c3   : > { %v2369_v59 = vpop.permute.xlu0 %2368 }
0x15c4   : > { %v2154_v38 = vpop.permute.xlu1 %2153  ;;  %v2371_v31 = vmul.f32 %v3956_v47, %v2369_v59  ;;  %v2477_v21 = vld [vmem:[%s3562_s24 + $0x20] sm:$0xff] (%p3368_p5) }
0x15c5   : > { %2733 = vst.msk [vmem:[%s3562_s24 + $0x30] sm:$0xff] %vm586_vm6, %v2154_v38  ;;  %2478 = vst [vmem:[%s2427_s15 + $0x40] sm:$0xff] (%p3368_p5), %v2477_v21 }
0x15c6   : > { %v2387_v39 = vsel %vm786_vm4, %v2371_v31, %v3945_v48  ;;  %v2379_v37 = vsel %vm786_vm4, %v2371_v31, 0.0  ;;  %vm2408_vm4 = vcmask 785408  }
0x15c7   : > { %2394 = vrot.lane.b32.xlu0 %v2387_v39, %s3290_s17  ;;  %v2403_v35 = vpop.permute.xlu0 %2402 }
0x15c8   : > { %v2479_v26 = vld [vmem:[%s3562_s24 + $0x28] sm:$0xff] (%p3368_p5) }
0x15c9   : > { %2480 = vst [vmem:[%s2427_s15 + $0x50] sm:$0xff] (%p3368_p5), %v2479_v26 }
0x15cb   : > { %2381 = vrot.lane.b32.xlu0 %v2379_v37, %s3291_s23  ;;  %v1027_v4 = vpop.permute.xlu0 %1026 }
0x15cc   : > { %2704 = vst.msk [vmem:[%s3574_s25 + $0x30] sm:$0xff] %vm586_vm6, %v1027_v4  ;;  %v2481_v16 = vld [vmem:[%s3562_s24 + $0x30] sm:$0xff] (%p3368_p5) }
0x15cd   : > { %2482 = vst [vmem:[%s2427_s15 + $0x60] sm:$0xff] (%p3368_p5), %v2481_v16 }
0x15cf   : > { %v1261_v33 = vpop.permute.xlu0 %1260 }
0x15d0   : > { %2710 = vst.msk [vmem:[%s3574_s25 + $0x28] sm:$0xff] %vm586_vm6, %v1261_v33 }
0x15d3   : > { %v1495_v42 = vpop.permute.xlu0 %1494 }
0x15d4   : > { %2716 = vst.msk [vmem:[%s3574_s25 + $0x20] sm:$0xff] %vm586_vm6, %v1495_v42 }
0x15d7   : > { %v1717_v48 = vpop.permute.xlu0 %1716 }
0x15d8   : > { %2722 = vst.msk [vmem:[%s3574_s25 + $0x18] sm:$0xff] %vm586_vm6, %v1717_v48 }
0x15db   : > { %v1939_v6 = vpop.permute.xlu0 %1938 }
0x15dc   : > { %2728 = vst.msk [vmem:[%s3574_s25 + $0x10] sm:$0xff] %vm586_vm6, %v1939_v6 }
0x15df   : > { %v2161_v52 = vpop.permute.xlu0 %2160 }
0x15e0   : > { %2734 = vst.msk [vmem:[%s3574_s25 + $0x8] sm:$0xff] %vm586_vm6, %v2161_v52 }
0x161e   : > { %v2391_v23 = vpop.permute.xlu1 %2390 }
0x1622   : > { %v2375_v10 = vpop.permute.xlu1 %2374 }
0x1623   : > { %2739 = vst.msk [vmem:[%s3562_s24 + $0x38] sm:$0xff] %vm586_vm6, %v2375_v10 }
0x162a   : > { %v2483_v11 = vld [vmem:[%s3562_s24 + $0x38] sm:$0xff] (%p3368_p5) }
0x162b   : > { %2484 = vst [vmem:[%s2427_s15 + $0x70] sm:$0xff] (%p3368_p5), %v2483_v11 }
0x1638   : > { %2425 = sbr.rel (!%p3368_p5) target bundleno = 5695 (0x163f), region = 86 }
0x1639   : > { %v2395_v44 = vpop.permute.xlu0 %2394 }
0x163a   : > { %v2405_v45 = vsel %vm586_vm6, %v2391_v23, %v2395_v44 }
0x163b   : > { %v2407_v17 = vsel %vm2406_vm0, %v2405_v45, %v2399_v2 }
0x163c   : > { %v2409_v13 = vsel %vm2408_vm4, %v2407_v17, %v2403_v35 }
0x163d   : > { %2410 = vst [vmem:[%s395_s10] sm:$0xff] %v2409_v13  ;;  %v2382_v15 = vpop.permute.xlu0 %2381 }
0x163e   : > { %2384 = vst.msk [vmem:[%s3574_s25] sm:$0xff] %vm586_vm6, %v2382_v15 }
0x163f PF: > { %2490 = sbr.rel (!%p3368_p5) target bundleno = 5703 (0x1647), region = 124  ;;  %s2743_s16 = sshll.u32 (%p3368_p5), %s3353_s30, 3  ;;  %v2536_v30 = vld [vmem:[%s3574_s25 + $0x8] sm:$0xff] (%p3368_p5)  ;;  %v2538_v24 = vld [vmem:[%s3574_s25 + $0x10] sm:$0xff] (%p3368_p5)  ;;  %v2540_v12 = vld [vmem:[%s3574_s25 + $0x18] sm:$0xff] (%p3368_p5) }
0x1640   : > { %s2492_s19 = scalar_lea.vmem (%p3368_p5), %s4115_s7, %s2743_s16  ;;  %v2542_v25 = vld [vmem:[%s3574_s25 + $0x20] sm:$0xff] (%p3368_p5)  ;;  %v2544_v27 = vld [vmem:[%s3574_s25 + $0x28] sm:$0xff] (%p3368_p5)  ;;  %v2546_v56 = vld [vmem:[%s3574_s25 + $0x30] sm:$0xff] (%p3368_p5) }
0x1641   : > { %2537 = vst [vmem:[%s2492_s19 + $0x10] sm:$0xff] (%p3368_p5), %v2536_v30  ;;  %2539 = vst [vmem:[%s2492_s19 + $0x20] sm:$0xff] (%p3368_p5), %v2538_v24  ;;  %v2548_v51 = vld [vmem:[%s3574_s25 + $0x38] sm:$0xff] (%p3368_p5) }
0x1642   : > { %2541 = vst [vmem:[%s2492_s19 + $0x30] sm:$0xff] (%p3368_p5), %v2540_v12  ;;  %2543 = vst [vmem:[%s2492_s19 + $0x40] sm:$0xff] (%p3368_p5), %v2542_v25 }
0x1643   : > { %2545 = vst [vmem:[%s2492_s19 + $0x50] sm:$0xff] (%p3368_p5), %v2544_v27  ;;  %2547 = vst [vmem:[%s2492_s19 + $0x60] sm:$0xff] (%p3368_p5), %v2546_v56 }
0x1644   : > { %2549 = vst [vmem:[%s2492_s19 + $0x70] sm:$0xff] (%p3368_p5), %v2548_v51 }
0x1645   : > { %v2534_v47 = vld [vmem:[%s3574_s25] sm:$0xff] (%p3368_p5) }
0x1646   : > { %2535 = vst [vmem:[%s2492_s19] sm:$0xff] %v2534_v47 }
0x1647 PF: > { %p16_p11 = scmp.ge.s32.totalorder %s3356_s9, 4   ;;  %s4118_s27 = smov %s3280_s28 }
0x1648   : > { %s4119_s28 = smov %s3366_s12  ;;  %s4120_s29 = smov %s3356_s9 }
0x1649   :  { %18 = sbr.rel (!%p16_p11) target bundleno = 2 (0x2), region = 248 }

</bundles_post_ra>
